<compile_context>
chip_gen: v7x
topology: tpu7x:2x2x1
jax: 0.10.0
libtpu: 0.0.40
codegen_flags: <defaults>
</compile_context>

<pallas_src>
import functools

import jax
import jax.numpy as jnp
import numpy as np
from jax import lax
from jax.experimental import pallas as pl
from jax.experimental.pallas import tpu as pltpu


# ----------------------------- Pallas kernel -------------------------------
def _self_attn_kernel(xq_ref, xkv_ref, abias_ref, kbias_ref,
                      ln_g_ref, ln_b_ref,
                      wq_ref, bq_ref, wkv_ref, bkv_ref,
                      wo_ref, bo_ref,
                      out_ref, attnw_ref,
                      *, d_model, num_heads, q_tile, seq_len, eps):
    head_dim = d_model // num_heads
    scale = 1.0 / np.sqrt(head_dim)

    def layer_norm(x):
        mean = jnp.mean(x, axis=-1, keepdims=True)
        var = jnp.mean(jnp.square(x - mean), axis=-1, keepdims=True)
        return ((x - mean) * lax.rsqrt(var + eps)) * ln_g_ref[0] + ln_b_ref[0]

    x_q = xq_ref[0]                      # (Tq, D) f32  residual / query rows
    x_kv = xkv_ref[0]                    # (L,  D) f32  full sequence

    # ---- Pre-LayerNorm (f32); cast to bf16 only for MXU operands ----
    xn_kv = layer_norm(x_kv).astype(jnp.bfloat16)                      # (L, D)
    if q_tile == seq_len:                # static: single q tile -> reuse
        xn_q = xn_kv
    else:
        xn_q = layer_norm(x_q).astype(jnp.bfloat16)                    # (Tq, D)

    # ---- Projections (weights pre-transposed in the wrapper) ----
    kv = jnp.dot(xn_kv, wkv_ref[...],
                 preferred_element_type=jnp.float32) + bkv_ref[0]      # (L, 2D)
    q = jnp.dot(xn_q, wq_ref[...],
                preferred_element_type=jnp.float32) + bq_ref[0]        # (Tq, D)

    # ---- Head-major views (cheap slices/stack; matmuls stay batched) ----
    q_b = (q * scale).astype(jnp.bfloat16)
    kv_b = kv.astype(jnp.bfloat16)
    q3 = jnp.stack([q_b[:, h * head_dim:(h + 1) * head_dim]
                    for h in range(num_heads)], axis=0)                # (H, Tq, hd)
    k3 = jnp.stack([kv_b[:, h * head_dim:(h + 1) * head_dim]
                    for h in range(num_heads)], axis=0)                # (H, L, hd)
    v3 = jnp.stack([kv_b[:, d_model + h * head_dim:d_model + (h + 1) * head_dim]
                    for h in range(num_heads)], axis=0)                # (H, L, hd)

    # ---- Scores for all heads in ONE batched dot (head = batch dim) ----
    scores = jnp.einsum("hqe,hke->hqk", q3, k3,
                        preferred_element_type=jnp.float32)            # (H, Tq, L)
    bias2d = abias_ref[...] + kbias_ref[0]                             # (Tq, L) f32
    scores = scores + bias2d[None, :, :]

    # ---- Softmax (f32; divide via EUP approx reciprocal) ----
    scores = scores - jnp.max(scores, axis=-1, keepdims=True)
    p = jnp.exp(scores)
    p = p * pl.reciprocal(jnp.sum(p, axis=-1, keepdims=True), approx=True)

    # ---- Context for all heads in ONE batched dot ----
    ctx = jnp.einsum("hqk,hke->hqe", p.astype(jnp.bfloat16), v3,
                     preferred_element_type=jnp.float32)               # (H, Tq, hd)

    # ---- Merge heads (small lane concat) + output projection + residual ----
    ctx_b = ctx.astype(jnp.bfloat16)
    ctx2d = jnp.concatenate([ctx_b[h] for h in range(num_heads)],
                            axis=-1)                                   # (Tq, D)
    attn_out = jnp.dot(ctx2d, wo_ref[...],
                       preferred_element_type=jnp.float32) + bo_ref[0]
    out_ref[0] = attn_out + x_q                     # dropout(p=0) is identity
    attnw_ref[0] = jnp.sum(p, axis=0) * (1.0 / num_heads)   # head-averaged


# ------------------------------ Wrapper ------------------------------------
def self_attention_layer(x, params, key_padding_mask=None, attn_mask=None,
                         eps=1e-5):
    """Pre-LN self-attention sub-layer.

    x: (B, L, D) float32
    key_padding_mask: optional (B, L) bool, True = masked key
    attn_mask: optional (L, L) bool, True = masked position
    Returns: (out (B, L, D), attn_weights (B, L, L))
    """
    B, L, D = x.shape
    H = params["num_heads"]
    neg = jnp.float32(-1e9)          # bf16/f32-safe "minus infinity"

    # Batch-invariant attn-mask bias (L, L) + per-batch key-padding bias (B,1,L).
    if attn_mask is not None:
        attn_bias = jnp.where(attn_mask, neg, jnp.float32(0.0))
    else:
        attn_bias = jnp.zeros((L, L), jnp.float32)
    if key_padding_mask is not None:
        kpm_bias = jnp.where(key_padding_mask, neg, jnp.float32(0.0))[:, None, :]
    else:
        kpm_bias = jnp.zeros((B, 1, L), jnp.float32)

    # Pre-transpose / split / cast the weights in the wrapper (free).
    w_in_t = params["w_in"].T                            # (D, 3D)
    w_q_t = w_in_t[:, :D].astype(jnp.bfloat16)           # (D, D)
    w_kv_t = w_in_t[:, D:].astype(jnp.bfloat16)          # (D, 2D)
    b_q = params["b_in"][:, :D]                          # (1, D)  f32
    b_kv = params["b_in"][:, D:]                         # (1, 2D) f32
    w_out_t = params["w_out"].T.astype(jnp.bfloat16)     # (D, D)

    # Query-tile size: whole sequence when short, 128-row tiles otherwise.
    q_tile = 128 if (L > 128 and L % 128 == 0) else L
    n_q = L // q_tile

    kernel = functools.partial(_self_attn_kernel, d_model=D, num_heads=H,
                               q_tile=q_tile, seq_len=L, eps=eps)

    out, attn_w = pl.pallas_call(
        kernel,
        out_shape=(jax.ShapeDtypeStruct((B, L, D), jnp.float32),
                   jax.ShapeDtypeStruct((B, L, L), jnp.float32)),
        grid_spec=pltpu.PrefetchScalarGridSpec(
            num_scalar_prefetch=0,
            grid=(B, n_q),
            in_specs=[
                pl.BlockSpec((1, q_tile, D), lambda b, qi: (b, qi, 0)),  # x (q rows)
                pl.BlockSpec((1, L, D),      lambda b, qi: (b, 0, 0)),   # x (kv rows)
                pl.BlockSpec((q_tile, L),    lambda b, qi: (qi, 0)),     # attn-mask bias
                pl.BlockSpec((1, 1, L),      lambda b, qi: (b, 0, 0)),   # key-pad bias
                pl.BlockSpec((1, D),         lambda b, qi: (0, 0)),      # ln gamma
                pl.BlockSpec((1, D),         lambda b, qi: (0, 0)),      # ln beta
                pl.BlockSpec((D, D),         lambda b, qi: (0, 0)),      # W_q^T (bf16)
                pl.BlockSpec((1, D),         lambda b, qi: (0, 0)),      # b_q
                pl.BlockSpec((D, 2 * D),     lambda b, qi: (0, 0)),      # W_kv^T (bf16)
                pl.BlockSpec((1, 2 * D),     lambda b, qi: (0, 0)),      # b_kv
                pl.BlockSpec((D, D),         lambda b, qi: (0, 0)),      # W_out^T (bf16)
                pl.BlockSpec((1, D),         lambda b, qi: (0, 0)),      # b_out
            ],
            out_specs=[
                pl.BlockSpec((1, q_tile, D), lambda b, qi: (b, qi, 0)),
                pl.BlockSpec((1, q_tile, L), lambda b, qi: (b, qi, 0)),
            ],
        ),
        compiler_params=pltpu.CompilerParams(
            dimension_semantics=("parallel", "parallel"),
            vmem_limit_bytes=64 * 1024 * 1024),
    )(x, x, attn_bias, kpm_bias,
      params["ln_gamma"], params["ln_beta"],
      w_q_t, b_q, w_kv_t, b_kv, w_out_t, params["b_out"])
    return out, attn_w


# --------------------------- Pure-JAX reference -----------------------------
def _reference(x, params, bias, eps=1e-5):
    B, L, D = x.shape
    H = params["num_heads"]
    hd = D // H
    mean = jnp.mean(x, -1, keepdims=True)
    var = jnp.mean(jnp.square(x - mean), -1, keepdims=True)
    xn = (x - mean) / jnp.sqrt(var + eps) * params["ln_gamma"][0] + params["ln_beta"][0]
    qkv = xn @ params["w_in"].T + params["b_in"][0]
    q, k, v = jnp.split(qkv, 3, axis=-1)
    q = q.reshape(B, L, H, hd).transpose(0, 2, 1, 3)
    k = k.reshape(B, L, H, hd).transpose(0, 2, 1, 3)
    v = v.reshape(B, L, H, hd).transpose(0, 2, 1, 3)
    s = jnp.einsum("bhqd,bhkd->bhqk", q, k) / np.sqrt(hd) + bias[:, None]
    p = jax.nn.softmax(s, axis=-1)
    ctx = jnp.einsum("bhqk,bhkd->bhqd", p, v).transpose(0, 2, 1, 3).reshape(B, L, D)
    out = ctx @ params["w_out"].T + params["b_out"][0] + x
    return out, jnp.mean(p, axis=1)


# ------------------------------- Main ---------------------------------------
if __name__ == "__main__":
    B, L, D, H = 2, 8, 32, 4

    key = jax.random.PRNGKey(0)
    kx, k1, k2, k3, k4 = jax.random.split(key, 5)

    x = jax.random.normal(kx, (B, L, D), jnp.float32)

    # Deterministic parameter init (shapes match nn.MultiheadAttention +
    # nn.LayerNorm in the PyTorch module's __init__).
    lim_in = 1.0 / np.sqrt(D)
    params = {
        "num_heads": H,
        "ln_gamma": jnp.ones((1, D), jnp.float32),
        "ln_beta": jnp.zeros((1, D), jnp.float32),
        "w_in": jax.random.uniform(k1, (3 * D, D), jnp.float32, -lim_in, lim_in),
        "b_in": jax.random.uniform(k2, (1, 3 * D), jnp.float32, -lim_in, lim_in),
        "w_out": jax.random.uniform(k3, (D, D), jnp.float32, -lim_in, lim_in),
        "b_out": jax.random.uniform(k4, (1, D), jnp.float32, -lim_in, lim_in),
    }

    # Causal attention mask (True = masked) + key padding for batch element 1.
    attn_mask = jnp.triu(jnp.ones((L, L), dtype=bool), k=1)
    key_padding_mask = jnp.zeros((B, L), dtype=bool).at[1, 6:].set(True)

    out, attn_w = self_attention_layer(x, params,
                                       key_padding_mask=key_padding_mask,
                                       attn_mask=attn_mask)
    out = jax.block_until_ready(out)
    attn_w = jax.block_until_ready(attn_w)

    # Cross-check against a pure-f32 JAX reference.  Kernel matmul operands are
    # bf16 (f32 accumulation), so tolerances are set accordingly.
    bias_full = (jnp.where(attn_mask, jnp.float32(-1e9), 0.0)[None, :, :]
                 + jnp.where(key_padding_mask, jnp.float32(-1e9), 0.0)[:, None, :])
    ref_out, ref_w = _reference(x, params, bias_full)
    np.testing.assert_allclose(np.asarray(out), np.asarray(ref_out),
                               rtol=3e-2, atol=3e-2)
    np.testing.assert_allclose(np.asarray(attn_w), np.asarray(ref_w),
                               rtol=3e-2, atol=3e-2)

    print("KERNEL_OK")
</pallas_src>

<mosaic_0001>
module attributes {stable_mosaic.version = 11 : i64} {
  func.func @_self_attn_kernel(%arg0: i32, %arg1: i32, %arg2: memref<1x8x32xf32, #tpu.memory_space<vmem>>, %arg3: memref<1x8x32xf32, #tpu.memory_space<vmem>>, %arg4: memref<8x8xf32, #tpu.memory_space<vmem>>, %arg5: memref<1x1x8xf32, #tpu.memory_space<vmem>>, %arg6: memref<1x32xf32, #tpu.memory_space<vmem>>, %arg7: memref<1x32xf32, #tpu.memory_space<vmem>>, %arg8: memref<32x32xbf16, #tpu.memory_space<vmem>>, %arg9: memref<1x32xf32, #tpu.memory_space<vmem>>, %arg10: memref<32x64xbf16, #tpu.memory_space<vmem>>, %arg11: memref<1x64xf32, #tpu.memory_space<vmem>>, %arg12: memref<32x32xbf16, #tpu.memory_space<vmem>>, %arg13: memref<1x32xf32, #tpu.memory_space<vmem>>, %arg14: memref<1x8x32xf32, #tpu.memory_space<vmem>>, %arg15: memref<1x8x8xf32, #tpu.memory_space<vmem>>) attributes {dimension_semantics = [#tpu.dimension_semantics<parallel>, #tpu.dimension_semantics<parallel>], iteration_bounds = array<i64: 2, 1>, scalar_prefetch = 0 : i64, scratch_operands = 0 : i64, tpu.core_type = #tpu.core_type<tc>, window_params = [{transform_indices = @transform_0, window_bounds = array<i64: 1, 8, 32>}, {transform_indices = @transform_1, window_bounds = array<i64: 1, 8, 32>}, {transform_indices = @transform_2, window_bounds = array<i64: 8, 8>}, {transform_indices = @transform_3, window_bounds = array<i64: 1, 1, 8>}, {pipeline_mode = #tpu.pipeline_mode<synchronous>, transform_indices = @transform_4, window_bounds = array<i64: 1, 32>}, {pipeline_mode = #tpu.pipeline_mode<synchronous>, transform_indices = @transform_5, window_bounds = array<i64: 1, 32>}, {pipeline_mode = #tpu.pipeline_mode<synchronous>, transform_indices = @transform_6, window_bounds = array<i64: 32, 32>}, {pipeline_mode = #tpu.pipeline_mode<synchronous>, transform_indices = @transform_7, window_bounds = array<i64: 1, 32>}, {pipeline_mode = #tpu.pipeline_mode<synchronous>, transform_indices = @transform_8, window_bounds = array<i64: 32, 64>}, {pipeline_mode = #tpu.pipeline_mode<synchronous>, transform_indices = @transform_9, window_bounds = array<i64: 1, 64>}, {pipeline_mode = #tpu.pipeline_mode<synchronous>, transform_indices = @transform_10, window_bounds = array<i64: 32, 32>}, {pipeline_mode = #tpu.pipeline_mode<synchronous>, transform_indices = @transform_11, window_bounds = array<i64: 1, 32>}, {transform_indices = @transform_12, window_bounds = array<i64: 1, 8, 32>}, {transform_indices = @transform_13, window_bounds = array<i64: 1, 8, 8>}]} {
    %c0 = arith.constant 0 : index
    %c0_0 = arith.constant 0 : index
    %c0_1 = arith.constant 0 : index
    %0 = vector.load %arg2[%c0, %c0_0, %c0_1] : memref<1x8x32xf32, #tpu.memory_space<vmem>>, vector<1x8x32xf32>
    %1 = vector.shape_cast %0 : vector<1x8x32xf32> to vector<8x32xf32>
    %c0_2 = arith.constant 0 : index
    %c0_3 = arith.constant 0 : index
    %c0_4 = arith.constant 0 : index
    %2 = vector.load %arg3[%c0_2, %c0_3, %c0_4] : memref<1x8x32xf32, #tpu.memory_space<vmem>>, vector<1x8x32xf32>
    %3 = vector.shape_cast %2 : vector<1x8x32xf32> to vector<8x32xf32>
    %cst = arith.constant dense<0.000000e+00> : vector<8xf32>
    %4 = vector.multi_reduction <add>, %3, %cst [1] : vector<8x32xf32> to vector<8xf32>
    %5 = vector.shape_cast %4 : vector<8xf32> to vector<8x1xf32>
    %cst_5 = arith.constant 3.200000e+01 : f32
    %6 = vector.broadcast %cst_5 : f32 to vector<8x1xf32>
    %7 = arith.divf %5, %6 : vector<8x1xf32>
    %8 = vector.broadcast %7 : vector<8x1xf32> to vector<8x32xf32>
    %9 = arith.subf %3, %8 : vector<8x32xf32>
    %10 = arith.mulf %9, %9 : vector<8x32xf32>
    %cst_6 = arith.constant dense<0.000000e+00> : vector<8xf32>
    %11 = vector.multi_reduction <add>, %10, %cst_6 [1] : vector<8x32xf32> to vector<8xf32>
    %12 = vector.shape_cast %11 : vector<8xf32> to vector<8x1xf32>
    %cst_7 = arith.constant 3.200000e+01 : f32
    %13 = vector.broadcast %cst_7 : f32 to vector<8x1xf32>
    %14 = arith.divf %12, %13 : vector<8x1xf32>
    %15 = vector.broadcast %7 : vector<8x1xf32> to vector<8x32xf32>
    %16 = arith.subf %3, %15 : vector<8x32xf32>
    %cst_8 = arith.constant 9.99999974E-6 : f32
    %17 = vector.broadcast %cst_8 : f32 to vector<8x1xf32>
    %18 = arith.addf %14, %17 : vector<8x1xf32>
    %19 = math.rsqrt %18 : vector<8x1xf32>
    %20 = vector.broadcast %19 : vector<8x1xf32> to vector<8x32xf32>
    %21 = arith.mulf %16, %20 : vector<8x32xf32>
    %c0_9 = arith.constant 0 : index
    %c0_10 = arith.constant 0 : index
    %22 = vector.load %arg6[%c0_9, %c0_10] : memref<1x32xf32, #tpu.memory_space<vmem>>, vector<1x32xf32>
    %23 = vector.shape_cast %22 : vector<1x32xf32> to vector<32xf32>
    %24 = vector.shape_cast %23 : vector<32xf32> to vector<1x32xf32>
    %25 = vector.broadcast %24 : vector<1x32xf32> to vector<8x32xf32>
    %26 = arith.mulf %21, %25 : vector<8x32xf32>
    %c0_11 = arith.constant 0 : index
    %c0_12 = arith.constant 0 : index
    %27 = vector.load %arg7[%c0_11, %c0_12] : memref<1x32xf32, #tpu.memory_space<vmem>>, vector<1x32xf32>
    %28 = vector.shape_cast %27 : vector<1x32xf32> to vector<32xf32>
    %29 = vector.shape_cast %28 : vector<32xf32> to vector<1x32xf32>
    %30 = vector.broadcast %29 : vector<1x32xf32> to vector<8x32xf32>
    %31 = arith.addf %26, %30 : vector<8x32xf32>
    %32 = arith.truncf %31 : vector<8x32xf32> to vector<8x32xbf16>
    %c0_13 = arith.constant 0 : index
    %c0_14 = arith.constant 0 : index
    %33 = vector.load %arg10[%c0_13, %c0_14] : memref<32x64xbf16, #tpu.memory_space<vmem>>, vector<32x64xbf16>
    %cst_15 = arith.constant dense<0.000000e+00> : vector<8x64xf32>
    %34 = tpu.matmul %32, %33, %cst_15 {dimension_numbers = #tpu.dot_dimension_numbers<[1], [0], [0], [1], [0, 0, 1, 1], [], []>} : vector<8x32xbf16>, vector<32x64xbf16>, vector<8x64xf32> -> vector<8x64xf32>
    %c0_16 = arith.constant 0 : index
    %c0_17 = arith.constant 0 : index
    %35 = vector.load %arg11[%c0_16, %c0_17] : memref<1x64xf32, #tpu.memory_space<vmem>>, vector<1x64xf32>
    %36 = vector.shape_cast %35 : vector<1x64xf32> to vector<64xf32>
    %37 = vector.shape_cast %36 : vector<64xf32> to vector<1x64xf32>
    %38 = vector.broadcast %37 : vector<1x64xf32> to vector<8x64xf32>
    %39 = arith.addf %34, %38 : vector<8x64xf32>
    %c0_18 = arith.constant 0 : index
    %c0_19 = arith.constant 0 : index
    %40 = vector.load %arg8[%c0_18, %c0_19] : memref<32x32xbf16, #tpu.memory_space<vmem>>, vector<32x32xbf16>
    %cst_20 = arith.constant dense<0.000000e+00> : vector<8x32xf32>
    %41 = tpu.matmul %32, %40, %cst_20 {dimension_numbers = #tpu.dot_dimension_numbers<[1], [0], [0], [1], [0, 0, 1, 1], [], []>} : vector<8x32xbf16>, vector<32x32xbf16>, vector<8x32xf32> -> vector<8x32xf32>
    %c0_21 = arith.constant 0 : index
    %c0_22 = arith.constant 0 : index
    %42 = vector.load %arg9[%c0_21, %c0_22] : memref<1x32xf32, #tpu.memory_space<vmem>>, vector<1x32xf32>
    %43 = vector.shape_cast %42 : vector<1x32xf32> to vector<32xf32>
    %44 = vector.shape_cast %43 : vector<32xf32> to vector<1x32xf32>
    %45 = vector.broadcast %44 : vector<1x32xf32> to vector<8x32xf32>
    %46 = arith.addf %41, %45 : vector<8x32xf32>
    %cst_23 = arith.constant 0.353553385 : f32
    %47 = vector.broadcast %cst_23 : f32 to vector<8x32xf32>
    %48 = arith.mulf %46, %47 : vector<8x32xf32>
    %49 = arith.truncf %48 : vector<8x32xf32> to vector<8x32xbf16>
    %50 = arith.truncf %39 : vector<8x64xf32> to vector<8x64xbf16>
    %51 = vector.extract_strided_slice %49 {offsets = [0, 0], sizes = [8, 8], strides = [1, 1]} : vector<8x32xbf16> to vector<8x8xbf16>
    %52 = vector.extract_strided_slice %49 {offsets = [0, 8], sizes = [8, 8], strides = [1, 1]} : vector<8x32xbf16> to vector<8x8xbf16>
    %53 = vector.extract_strided_slice %49 {offsets = [0, 16], sizes = [8, 8], strides = [1, 1]} : vector<8x32xbf16> to vector<8x8xbf16>
    %54 = vector.extract_strided_slice %49 {offsets = [0, 24], sizes = [8, 8], strides = [1, 1]} : vector<8x32xbf16> to vector<8x8xbf16>
    %55 = vector.shape_cast %51 : vector<8x8xbf16> to vector<1x8x8xbf16>
    %56 = vector.shape_cast %52 : vector<8x8xbf16> to vector<1x8x8xbf16>
    %57 = vector.shape_cast %53 : vector<8x8xbf16> to vector<1x8x8xbf16>
    %58 = vector.shape_cast %54 : vector<8x8xbf16> to vector<1x8x8xbf16>
    %59 = tpu.concatenate %55, %56, %57, %58 in 0 : vector<1x8x8xbf16>, vector<1x8x8xbf16>, vector<1x8x8xbf16>, vector<1x8x8xbf16> -> vector<4x8x8xbf16>
    %60 = vector.extract_strided_slice %50 {offsets = [0, 0], sizes = [8, 8], strides = [1, 1]} : vector<8x64xbf16> to vector<8x8xbf16>
    %61 = vector.extract_strided_slice %50 {offsets = [0, 8], sizes = [8, 8], strides = [1, 1]} : vector<8x64xbf16> to vector<8x8xbf16>
    %62 = vector.extract_strided_slice %50 {offsets = [0, 16], sizes = [8, 8], strides = [1, 1]} : vector<8x64xbf16> to vector<8x8xbf16>
    %63 = vector.extract_strided_slice %50 {offsets = [0, 24], sizes = [8, 8], strides = [1, 1]} : vector<8x64xbf16> to vector<8x8xbf16>
    %64 = vector.shape_cast %60 : vector<8x8xbf16> to vector<1x8x8xbf16>
    %65 = vector.shape_cast %61 : vector<8x8xbf16> to vector<1x8x8xbf16>
    %66 = vector.shape_cast %62 : vector<8x8xbf16> to vector<1x8x8xbf16>
    %67 = vector.shape_cast %63 : vector<8x8xbf16> to vector<1x8x8xbf16>
    %68 = tpu.concatenate %64, %65, %66, %67 in 0 : vector<1x8x8xbf16>, vector<1x8x8xbf16>, vector<1x8x8xbf16>, vector<1x8x8xbf16> -> vector<4x8x8xbf16>
    %69 = vector.extract_strided_slice %50 {offsets = [0, 32], sizes = [8, 8], strides = [1, 1]} : vector<8x64xbf16> to vector<8x8xbf16>
    %70 = vector.extract_strided_slice %50 {offsets = [0, 40], sizes = [8, 8], strides = [1, 1]} : vector<8x64xbf16> to vector<8x8xbf16>
    %71 = vector.extract_strided_slice %50 {offsets = [0, 48], sizes = [8, 8], strides = [1, 1]} : vector<8x64xbf16> to vector<8x8xbf16>
    %72 = vector.extract_strided_slice %50 {offsets = [0, 56], sizes = [8, 8], strides = [1, 1]} : vector<8x64xbf16> to vector<8x8xbf16>
    %73 = vector.shape_cast %69 : vector<8x8xbf16> to vector<1x8x8xbf16>
    %74 = vector.shape_cast %70 : vector<8x8xbf16> to vector<1x8x8xbf16>
    %75 = vector.shape_cast %71 : vector<8x8xbf16> to vector<1x8x8xbf16>
    %76 = vector.shape_cast %72 : vector<8x8xbf16> to vector<1x8x8xbf16>
    %77 = tpu.concatenate %73, %74, %75, %76 in 0 : vector<1x8x8xbf16>, vector<1x8x8xbf16>, vector<1x8x8xbf16>, vector<1x8x8xbf16> -> vector<4x8x8xbf16>
    "tpu.trace_start"() <{level = 10 : i32, message = "hqe,hke->hqk"}> : () -> ()
    %cst_24 = arith.constant dense<0.000000e+00> : vector<4x8x8xf32>
    %78 = tpu.matmul %59, %68, %cst_24 {dimension_numbers = #tpu.dot_dimension_numbers<[2], [2], [1], [1], [0, 0, 0, 1, 1, 1], [0], [0]>} : vector<4x8x8xbf16>, vector<4x8x8xbf16>, vector<4x8x8xf32> -> vector<4x8x8xf32>
    "tpu.trace_stop"() : () -> ()
    %c0_25 = arith.constant 0 : index
    %c0_26 = arith.constant 0 : index
    %79 = vector.load %arg4[%c0_25, %c0_26] : memref<8x8xf32, #tpu.memory_space<vmem>>, vector<8x8xf32>
    %c0_27 = arith.constant 0 : index
    %c0_28 = arith.constant 0 : index
    %c0_29 = arith.constant 0 : index
    %80 = vector.load %arg5[%c0_27, %c0_28, %c0_29] : memref<1x1x8xf32, #tpu.memory_space<vmem>>, vector<1x1x8xf32>
    %81 = vector.shape_cast %80 : vector<1x1x8xf32> to vector<1x8xf32>
    %82 = vector.broadcast %81 : vector<1x8xf32> to vector<8x8xf32>
    %83 = arith.addf %79, %82 : vector<8x8xf32>
    %84 = vector.shape_cast %83 : vector<8x8xf32> to vector<1x8x8xf32>
    %85 = vector.broadcast %84 : vector<1x8x8xf32> to vector<4x8x8xf32>
    %86 = arith.addf %78, %85 : vector<4x8x8xf32>
    %cst_30 = arith.constant dense<0xFF800000> : vector<4x8xf32>
    %87 = vector.multi_reduction <maximumf>, %86, %cst_30 [2] : vector<4x8x8xf32> to vector<4x8xf32>
    %88 = vector.shape_cast %87 : vector<4x8xf32> to vector<4x8x1xf32>
    %89 = vector.broadcast %88 : vector<4x8x1xf32> to vector<4x8x8xf32>
    %90 = arith.subf %86, %89 : vector<4x8x8xf32>
    %91 = math.exp %90 : vector<4x8x8xf32>
    %cst_31 = arith.constant dense<0.000000e+00> : vector<4x8xf32>
    %92 = vector.multi_reduction <add>, %91, %cst_31 [2] : vector<4x8x8xf32> to vector<4x8xf32>
    %93 = vector.shape_cast %92 : vector<4x8xf32> to vector<4x8x1xf32>
    %94 = tpu.reciprocal %93 {approx = true} : vector<4x8x1xf32> -> vector<4x8x1xf32>
    %95 = vector.broadcast %94 : vector<4x8x1xf32> to vector<4x8x8xf32>
    %96 = arith.mulf %91, %95 : vector<4x8x8xf32>
    %97 = arith.truncf %96 : vector<4x8x8xf32> to vector<4x8x8xbf16>
    "tpu.trace_start"() <{level = 10 : i32, message = "hqk,hke->hqe"}> : () -> ()
    %cst_32 = arith.constant dense<0.000000e+00> : vector<4x8x8xf32>
    %98 = tpu.matmul %97, %77, %cst_32 {dimension_numbers = #tpu.dot_dimension_numbers<[2], [1], [1], [2], [0, 0, 0, 1, 1, 2], [0], [0]>} : vector<4x8x8xbf16>, vector<4x8x8xbf16>, vector<4x8x8xf32> -> vector<4x8x8xf32>
    "tpu.trace_stop"() : () -> ()
    %99 = arith.truncf %98 : vector<4x8x8xf32> to vector<4x8x8xbf16>
    %100 = vector.extract_strided_slice %99 {offsets = [0, 0, 0], sizes = [1, 8, 8], strides = [1, 1, 1]} : vector<4x8x8xbf16> to vector<1x8x8xbf16>
    %101 = vector.shape_cast %100 : vector<1x8x8xbf16> to vector<8x8xbf16>
    %102 = vector.extract_strided_slice %99 {offsets = [1, 0, 0], sizes = [1, 8, 8], strides = [1, 1, 1]} : vector<4x8x8xbf16> to vector<1x8x8xbf16>
    %103 = vector.shape_cast %102 : vector<1x8x8xbf16> to vector<8x8xbf16>
    %104 = vector.extract_strided_slice %99 {offsets = [2, 0, 0], sizes = [1, 8, 8], strides = [1, 1, 1]} : vector<4x8x8xbf16> to vector<1x8x8xbf16>
    %105 = vector.shape_cast %104 : vector<1x8x8xbf16> to vector<8x8xbf16>
    %106 = vector.extract_strided_slice %99 {offsets = [3, 0, 0], sizes = [1, 8, 8], strides = [1, 1, 1]} : vector<4x8x8xbf16> to vector<1x8x8xbf16>
    %107 = vector.shape_cast %106 : vector<1x8x8xbf16> to vector<8x8xbf16>
    %108 = tpu.concatenate %101, %103, %105, %107 in 1 : vector<8x8xbf16>, vector<8x8xbf16>, vector<8x8xbf16>, vector<8x8xbf16> -> vector<8x32xbf16>
    %c0_33 = arith.constant 0 : index
    %c0_34 = arith.constant 0 : index
    %109 = vector.load %arg12[%c0_33, %c0_34] : memref<32x32xbf16, #tpu.memory_space<vmem>>, vector<32x32xbf16>
    %cst_35 = arith.constant dense<0.000000e+00> : vector<8x32xf32>
    %110 = tpu.matmul %108, %109, %cst_35 {dimension_numbers = #tpu.dot_dimension_numbers<[1], [0], [0], [1], [0, 0, 1, 1], [], []>} : vector<8x32xbf16>, vector<32x32xbf16>, vector<8x32xf32> -> vector<8x32xf32>
    %c0_36 = arith.constant 0 : index
    %c0_37 = arith.constant 0 : index
    %111 = vector.load %arg13[%c0_36, %c0_37] : memref<1x32xf32, #tpu.memory_space<vmem>>, vector<1x32xf32>
    %112 = vector.shape_cast %111 : vector<1x32xf32> to vector<32xf32>
    %113 = vector.shape_cast %112 : vector<32xf32> to vector<1x32xf32>
    %114 = vector.broadcast %113 : vector<1x32xf32> to vector<8x32xf32>
    %115 = arith.addf %110, %114 : vector<8x32xf32>
    %116 = arith.addf %115, %1 : vector<8x32xf32>
    %c0_38 = arith.constant 0 : index
    %c0_39 = arith.constant 0 : index
    %c0_40 = arith.constant 0 : index
    %117 = vector.load %arg14[%c0_38, %c0_39, %c0_40] : memref<1x8x32xf32, #tpu.memory_space<vmem>>, vector<1x8x32xf32>
    %118 = vector.shape_cast %117 : vector<1x8x32xf32> to vector<8x32xf32>
    %119 = vector.shape_cast %116 : vector<8x32xf32> to vector<1x8x32xf32>
    tpu.vector_store %arg14[%c0_38, %c0_39, %c0_40], %119 {strides = array<i32>} : memref<1x8x32xf32, #tpu.memory_space<vmem>>, vector<1x8x32xf32>,
    %cst_41 = arith.constant dense<0.000000e+00> : vector<8x8xf32>
    %120 = vector.multi_reduction <add>, %96, %cst_41 [0] : vector<4x8x8xf32> to vector<8x8xf32>
    %cst_42 = arith.constant 2.500000e-01 : f32
    %121 = vector.broadcast %cst_42 : f32 to vector<8x8xf32>
    %122 = arith.mulf %120, %121 : vector<8x8xf32>
    %c0_43 = arith.constant 0 : index
    %c0_44 = arith.constant 0 : index
    %c0_45 = arith.constant 0 : index
    %123 = vector.load %arg15[%c0_43, %c0_44, %c0_45] : memref<1x8x8xf32, #tpu.memory_space<vmem>>, vector<1x8x8xf32>
    %124 = vector.shape_cast %123 : vector<1x8x8xf32> to vector<8x8xf32>
    %125 = vector.shape_cast %122 : vector<8x8xf32> to vector<1x8x8xf32>
    tpu.vector_store %arg15[%c0_43, %c0_44, %c0_45], %125 {strides = array<i32>} : memref<1x8x8xf32, #tpu.memory_space<vmem>>, vector<1x8x8xf32>,
    return
  }
  func.func @transform_0(%arg0: i32, %arg1: i32) -> (i32, i32, i32) {
    %c0_i32 = arith.constant 0 : i32
    %c0_i32_0 = arith.constant 0 : i32
    return %arg0, %arg1, %c0_i32 : i32, i32, i32
  }
  func.func @transform_1(%arg0: i32, %arg1: i32) -> (i32, i32, i32) {
    %c0_i32 = arith.constant 0 : i32
    %c0_i32_0 = arith.constant 0 : i32
    %c0_i32_1 = arith.constant 0 : i32
    return %arg0, %c0_i32, %c0_i32_0 : i32, i32, i32
  }
  func.func @transform_2(%arg0: i32, %arg1: i32) -> (i32, i32) {
    %c0_i32 = arith.constant 0 : i32
    %c0_i32_0 = arith.constant 0 : i32
    return %arg1, %c0_i32 : i32, i32
  }
  func.func @transform_3(%arg0: i32, %arg1: i32) -> (i32, i32, i32) {
    %c0_i32 = arith.constant 0 : i32
    %c0_i32_0 = arith.constant 0 : i32
    %c0_i32_1 = arith.constant 0 : i32
    return %arg0, %c0_i32, %c0_i32_0 : i32, i32, i32
  }
  func.func @transform_4(%arg0: i32, %arg1: i32) -> (i32, i32) {
    %c0_i32 = arith.constant 0 : i32
    %c0_i32_0 = arith.constant 0 : i32
    %c0_i32_1 = arith.constant 0 : i32
    return %c0_i32, %c0_i32_0 : i32, i32
  }
  func.func @transform_5(%arg0: i32, %arg1: i32) -> (i32, i32) {
    %c0_i32 = arith.constant 0 : i32
    %c0_i32_0 = arith.constant 0 : i32
    %c0_i32_1 = arith.constant 0 : i32
    return %c0_i32, %c0_i32_0 : i32, i32
  }
  func.func @transform_6(%arg0: i32, %arg1: i32) -> (i32, i32) {
    %c0_i32 = arith.constant 0 : i32
    %c0_i32_0 = arith.constant 0 : i32
    %c0_i32_1 = arith.constant 0 : i32
    return %c0_i32, %c0_i32_0 : i32, i32
  }
  func.func @transform_7(%arg0: i32, %arg1: i32) -> (i32, i32) {
    %c0_i32 = arith.constant 0 : i32
    %c0_i32_0 = arith.constant 0 : i32
    %c0_i32_1 = arith.constant 0 : i32
    return %c0_i32, %c0_i32_0 : i32, i32
  }
  func.func @transform_8(%arg0: i32, %arg1: i32) -> (i32, i32) {
    %c0_i32 = arith.constant 0 : i32
    %c0_i32_0 = arith.constant 0 : i32
    %c0_i32_1 = arith.constant 0 : i32
    return %c0_i32, %c0_i32_0 : i32, i32
  }
  func.func @transform_9(%arg0: i32, %arg1: i32) -> (i32, i32) {
    %c0_i32 = arith.constant 0 : i32
    %c0_i32_0 = arith.constant 0 : i32
    %c0_i32_1 = arith.constant 0 : i32
    return %c0_i32, %c0_i32_0 : i32, i32
  }
  func.func @transform_10(%arg0: i32, %arg1: i32) -> (i32, i32) {
    %c0_i32 = arith.constant 0 : i32
    %c0_i32_0 = arith.constant 0 : i32
    %c0_i32_1 = arith.constant 0 : i32
    return %c0_i32, %c0_i32_0 : i32, i32
  }
  func.func @transform_11(%arg0: i32, %arg1: i32) -> (i32, i32) {
    %c0_i32 = arith.constant 0 : i32
    %c0_i32_0 = arith.constant 0 : i32
    %c0_i32_1 = arith.constant 0 : i32
    return %c0_i32, %c0_i32_0 : i32, i32
  }
  func.func @transform_12(%arg0: i32, %arg1: i32) -> (i32, i32, i32) {
    %c0_i32 = arith.constant 0 : i32
    %c0_i32_0 = arith.constant 0 : i32
    return %arg0, %arg1, %c0_i32 : i32, i32, i32
  }
  func.func @transform_13(%arg0: i32, %arg1: i32) -> (i32, i32, i32) {
    %c0_i32 = arith.constant 0 : i32
    %c0_i32_0 = arith.constant 0 : i32
    return %arg0, %arg1, %c0_i32 : i32, i32, i32
  }
}

</mosaic_0001>

<bundles_post_ra>
// kernel: tpu_custom_call.1
= control target key start
LH: loop header
LB: loop body
LE: loop exit
PB: predicated region body
PF: predicated region fallthrough
CT: control target
= control target key end

     0   :  { %s3234_s0 = inlined_call_operand.hbm [shape: f32[2,8,32], index: 0, kind: input, shape index: {}]   ;;  %s3235_s1 = inlined_call_operand.hbm [shape: f32[2,8,32], index: 1, kind: input, shape index: {}]   ;;  %s3236_s2 = inlined_call_operand.hbm [shape: f32[8,8], index: 2, kind: input, shape index: {}]   ;;  %s3237_s3 = inlined_call_operand.hbm [shape: f32[2,1,8], index: 3, kind: input, shape index: {}]   ;;  %s3238_s4 = inlined_call_operand.hbm [shape: f32[1,32], index: 4, kind: input, shape index: {}]   ;;  %s3239_s5 = inlined_call_operand.hbm [shape: f32[1,32], index: 5, kind: input, shape index: {}]   ;;  %s3240_s6 = inlined_call_operand.hbm [shape: bf16[32,32], index: 6, kind: input, shape index: {}]   ;;  %s3241_s7 = inlined_call_operand.hbm [shape: f32[1,32], index: 7, kind: input, shape index: {}]   ;;  %s3242_s8 = inlined_call_operand.hbm [shape: bf16[32,64], index: 8, kind: input, shape index: {}]   ;;  %s3243_s9 = inlined_call_operand.hbm [shape: f32[1,64], index: 9, kind: input, shape index: {}]   ;;  %s3244_s10 = inlined_call_operand.hbm [shape: bf16[32,32], index: 10, kind: input, shape index: {}]   ;;  %s3245_s11 = inlined_call_operand.hbm [shape: f32[1,32], index: 11, kind: input, shape index: {}]   ;;  %s3246_s12 = inlined_call_operand.hbm [shape: f32[2,8,32], index: 12, kind: output, shape index: {0}]   ;;  %s3247_s13 = inlined_call_operand.hbm [shape: f32[2,8,8], index: 13, kind: output, shape index: {1}]  }
   0x1   :  { %3260 = sst [smem:[#allocation38_spill]] %s3234_s0 }
   0x2   :  { %3261 = sst [smem:[#allocation39_spill]] %s3236_s2 }
   0x3   :  { %3262 = sst [smem:[#allocation40_spill]] %s3237_s3 }
   0x4   :  { %3263 = sst [smem:[#allocation41_spill]] %s3238_s4 }
   0x5   :  { %3264 = sst [smem:[#allocation42_spill]] %s3239_s5 }
   0x6   :  { %3265 = sst [smem:[#allocation43_spill]] %s3240_s6 }
   0x7   :  { %3266 = sst [smem:[#allocation44_spill]] %s3241_s7 }
   0x8   :  { %3267 = sst [smem:[#allocation45_spill]] %s3242_s8 }
   0x9   :  { %3268 = sst [smem:[#allocation46_spill]] %s3243_s9 }
   0xa   :  { %3269 = sst [smem:[#allocation47_spill]] %s3244_s10 }
   0xb   :  { %3270 = sst [smem:[#allocation48_spill]] %s3246_s12 }
   0xc   :  { %3271 = sst [smem:[#allocation49_spill]] %s3247_s13 }
   0xd   :  { %19 = vsyncpa [#allocation3], 0 }
   0xe   :  { %21 = vsyncpa [#allocation3 + $0x1], 0 }
   0xf   :  { %22 = vsyncpa [#allocation6], 0 }
  0x10   :  { %24 = vsyncpa [#allocation6 + $0x1], 0 }
  0x11   :  { %25 = vsyncpa [#allocation9], 0 }
  0x12   :  { %27 = vsyncpa [#allocation9 + $0x1], 0 }
  0x13   :  { %28 = vsyncpa [#allocation12], 0 }
  0x14   :  { %29 = vsyncpa [#allocation15], 0 }
  0x15   :  { %30 = vsyncpa [#allocation18], 0 }
  0x16   :  { %31 = vsyncpa [#allocation21], 0 }
  0x17   :  { %32 = vsyncpa [#allocation4], 0 }
  0x18   :  { %34 = vsyncpa [#allocation4 + $0x1], 0 }
  0x19   :  { %35 = vsyncpa [#allocation24], 0 }
  0x1a   :  { %37 = vsyncpa [#allocation24 + $0x1], 0  ;;  %s2619_s25 = smov 0   ;;  %s2621_s26 = smov 0  }
  0x1b   :  { %s2623_s27 = smov 0   ;;  %s2625_s28 = smov 0  }
  0x1c   :  { %s2627_s29 = smov 0   ;;  %s2629_s30 = smov 0  }
  0x1d LB: > { %3272 = sst [smem:[#allocation36_spill]] %s2514_s28  ;;  %s2650_s14 = sadd.s32 4294967295, %s2522_s30   ;;  %s2522_s30 = sphi %s2629_s30, %s43_s30   ;;  %s2518_s29 = sphi %s2627_s29, %s3324_s29   ;;  %s2514_s28 = sphi %s2625_s28, %s3323_s28   ;;  %s2510_s27 = sphi %s2623_s27, %s3322_s27   ;;  %s2506_s26 = sphi %s2621_s26, %s3321_s26   ;;  %s2502_s25 = sphi %s2619_s25, %s3320_s25  }
  0x1e   : > { %p1675_p0 = scmp.ge.s32.totalorder %s2522_s30, 1  ;;  %p3251_p1 = scmp.eq.s32.totalorder %s2650_s14, 0 }
  0x1f   : > { %p390_p2 = scmp.lt.s32.totalorder %s2522_s30, 3  ;;  %s2524_s16 = smov [#allocation7]  }
  0x20   : > { %s405_s17 = sshll.u32 %s2524_s16, 4  ;;  %s2525_s18 = smov [#allocation10]   ;;  %s406_s17 = int_to_ptr.vmem [resolvable:$true] %s405_s17 }
  0x21   : > { %p2655_p3 = pnand %p1675_p0, %p390_p2  ;;  %s416_s19 = sshll.u32 %s2525_s18, 4  ;;  %s2668_s19 = int_to_ptr.vmem [resolvable:$true] %s416_s19 }
  0x22   : > { %s2526_s21 = smov [#allocation11]   ;;  %s3276_s2 = sld [smem:[#allocation39_spill]] }
  0x23   : > { %s3273_s15 = scalar_select %p2655_p3, 1, 0 }
  0x24   : > { %p1877_p5 = pneg %p2655_p3  ;;  %s427_s22 = sshll.u32 %s2526_s21, 4  ;;  %s2670_s22 = int_to_ptr.vmem [resolvable:$true] %s427_s22 }
  0x25   : > { %3274 = sst [smem:[#allocation37_spill]] %s3273_s15 }
  0x26   : > { %p2664_p6 = pnand %p1877_p5, %p3251_p1 }
  0x28   : > { %s2034_s16 = scalar_lea.hbm %s3276_s2, 128  ;;  %p2680_p8 = pneg %p2664_p6 }
  0x29   : > { %p2035_p7 = scmp.ne.s32.totalorder %s3276_s2, %s2034_s16  ;;  %p2041_p11 = scmp.lt.u32.totalorder %s2034_s16, %s3276_s2 }
  0x2b   : > { %p2037_p9 = pnand %p2680_p8, %p2035_p7 }
  0x2d   : > { %p2038_p10 = pneg %p2037_p9 }
  0x2f   : > { %p2043_p12 = pnand %p2041_p11, %p2038_p10 }
  0x31   : > { %2046 = shalt.err (!%p2043_p12)
}
  0x32   : > { %s2047_s23 = scalar_lea.vmem %s406_s17, 128  ;;  %p2055_p5 = scmp.lt.s32.totalorder %s406_s17, %s406_s17 }
  0x33   : > { %p2048_p13 = scmp.ne.s32.totalorder %s406_s17, %s2047_s23  ;;  %p2056_p4 = scmp.lt.s32.totalorder %s2047_s23, %s2047_s23 }
  0x35   : > { %p2050_p0 = pnand %p2048_p13, %p2680_p8  ;;  %p2057_p1 = por %p2056_p4, %p2055_p5 }
  0x37   : > { %p2051_p2 = pneg %p2050_p0 }
  0x39   : > { %p2058_p3 = pnand %p2057_p1, %p2051_p2 }
  0x3b   : > { %2061 = shalt.err (!%p2058_p3)
}
  0x3c   : > { %1880 = dma.hbm_to_vmem [thread:$0]  (!%p2664_p6), %s3276_s2, 128, %s406_s17, [#allocation6]  }
  0x3d   : > { %s3278_s4 = sld [smem:[#allocation41_spill]] }
  0x43   : > { %s2062_s16 = scalar_lea.hbm %s3278_s4, 16 }
  0x44   : > { %p2063_p7 = scmp.ne.s32.totalorder %s3278_s4, %s2062_s16  ;;  %p2069_p1 = scmp.lt.u32.totalorder %s2062_s16, %s3278_s4 }
  0x46   : > { %p2065_p9 = pnand %p2063_p7, %p2680_p8 }
  0x48   : > { %p2066_p4 = pneg %p2065_p9 }
  0x4a   : > { %p2071_p3 = pnand %p2069_p1, %p2066_p4 }
  0x4c   : > { %2074 = shalt.err (!%p2071_p3)
}
  0x4d   : > { %s2075_s17 = scalar_lea.vmem %s2668_s19, 16  ;;  %s2082_s15 = scalar_lea.vmem %s2668_s19, 32 }
  0x4e   : > { %p2076_p10 = scmp.ne.s32.totalorder %s2668_s19, %s2075_s17  ;;  %p2083_p13 = scmp.lt.s32.totalorder %s2668_s19, %s2668_s19 }
  0x4f   : > { %p2084_p0 = scmp.lt.s32.totalorder %s2082_s15, %s2075_s17 }
  0x50   : > { %p2078_p11 = pnand %p2076_p10, %p2680_p8 }
  0x51   : > { %p2085_p2 = por %p2084_p0, %p2083_p13 }
  0x52   : > { %p2079_p12 = pneg %p2078_p11 }
  0x54   : > { %p2086_p5 = pnand %p2085_p2, %p2079_p12 }
  0x56   : > { %2089 = shalt.err (!%p2086_p5)
}
  0x57   : > { %1883 = dma.hbm_to_vmem [thread:$0]  (!%p2664_p6), %s3278_s4, 16, %s2668_s19, [#allocation9]  }
  0x58   : > { %s3279_s5 = sld [smem:[#allocation42_spill]] }
  0x5e   : > { %s2090_s24 = scalar_lea.hbm %s3279_s5, 16 }
  0x5f   : > { %p2091_p7 = scmp.ne.s32.totalorder %s3279_s5, %s2090_s24  ;;  %p2097_p1 = scmp.lt.u32.totalorder %s2090_s24, %s3279_s5 }
  0x61   : > { %p2093_p9 = pnand %p2091_p7, %p2680_p8 }
  0x63   : > { %p2094_p4 = pneg %p2093_p9 }
  0x65   : > { %p2099_p3 = pnand %p2097_p1, %p2094_p4 }
  0x67   : > { %2102 = shalt.err (!%p2099_p3)
}
  0x68   : > { %s2103_s19 = scalar_lea.vmem %s2670_s22, 16  ;;  %s2110_s15 = scalar_lea.vmem %s2670_s22, 32 }
  0x69   : > { %p2104_p10 = scmp.ne.s32.totalorder %s2670_s22, %s2103_s19  ;;  %p2111_p13 = scmp.lt.s32.totalorder %s2670_s22, %s2670_s22 }
  0x6a   : > { %p2112_p0 = scmp.lt.s32.totalorder %s2110_s15, %s2103_s19 }
  0x6b   : > { %p2106_p11 = pnand %p2104_p10, %p2680_p8 }
  0x6c   : > { %p2113_p2 = por %p2112_p0, %p2111_p13 }
  0x6d   : > { %p2107_p12 = pneg %p2106_p11 }
  0x6f   : > { %p2114_p5 = pnand %p2113_p2, %p2107_p12 }
  0x71   : > { %2117 = shalt.err (!%p2114_p5)
}
  0x72   : > { %1886 = dma.hbm_to_vmem [thread:$0]  (!%p2664_p6), %s3279_s5, 16, %s2670_s22, [#allocation12]  }
  0x73   : > { %s2527_s13 = smov [#allocation14]   ;;  %s2528_s24 = smov [#allocation17]  }
  0x74   : > { %s451_s28 = sshll.u32 %s2527_s13, 4  ;;  %s475_s16 = sshll.u32 %s2528_s24, 4  ;;  %s452_s28 = int_to_ptr.vmem [resolvable:$true] %s451_s28  ;;  %s476_s16 = int_to_ptr.vmem [resolvable:$true] %s475_s16 }
  0x75   : > { %s3280_s7 = sld [smem:[#allocation44_spill]] }
  0x7b   : > { %s2118_s17 = scalar_lea.hbm %s3280_s7, 16 }
  0x7c   : > { %p2119_p7 = scmp.ne.s32.totalorder %s3280_s7, %s2118_s17  ;;  %p2125_p1 = scmp.lt.u32.totalorder %s2118_s17, %s3280_s7 }
  0x7e   : > { %p2121_p9 = pnand %p2119_p7, %p2680_p8 }
  0x80   : > { %p2122_p4 = pneg %p2121_p9 }
  0x82   : > { %p2127_p3 = pnand %p2125_p1, %p2122_p4 }
  0x84   : > { %2130 = shalt.err (!%p2127_p3)
}
  0x85   : > { %s2131_s22 = scalar_lea.vmem %s452_s28, 16  ;;  %s2138_s12 = scalar_lea.vmem %s452_s28, 32 }
  0x86   : > { %p2132_p10 = scmp.ne.s32.totalorder %s452_s28, %s2131_s22  ;;  %p2139_p13 = scmp.lt.s32.totalorder %s452_s28, %s452_s28 }
  0x87   : > { %p2140_p0 = scmp.lt.s32.totalorder %s2138_s12, %s2131_s22 }
  0x88   : > { %p2134_p11 = pnand %p2132_p10, %p2680_p8 }
  0x89   : > { %p2141_p2 = por %p2140_p0, %p2139_p13 }
  0x8a   : > { %p2135_p12 = pneg %p2134_p11 }
  0x8c   : > { %p2142_p5 = pnand %p2141_p2, %p2135_p12 }
  0x8e   : > { %2145 = shalt.err (!%p2142_p5)
}
  0x8f   : > { %1892 = dma.hbm_to_vmem [thread:$0]  (!%p2664_p6), %s3280_s7, 16, %s452_s28, [#allocation15]  }
  0x90   : > { %s3281_s9 = sld [smem:[#allocation46_spill]] }
  0x96   : > { %s2146_s23 = scalar_lea.hbm %s3281_s9, 16 }
  0x97   : > { %p2147_p7 = scmp.ne.s32.totalorder %s3281_s9, %s2146_s23  ;;  %p2153_p1 = scmp.lt.u32.totalorder %s2146_s23, %s3281_s9 }
  0x99   : > { %p2149_p9 = pnand %p2147_p7, %p2680_p8 }
  0x9b   : > { %p2150_p4 = pneg %p2149_p9 }
  0x9d   : > { %p2155_p3 = pnand %p2153_p1, %p2150_p4 }
  0x9f   : > { %2158 = shalt.err (!%p2155_p3)
}
  0xa0   : > { %s2159_s22 = scalar_lea.vmem %s476_s16, 16  ;;  %s2166_s28 = scalar_lea.vmem %s476_s16, 32 }
  0xa1   : > { %p2160_p10 = scmp.ne.s32.totalorder %s476_s16, %s2159_s22  ;;  %p2167_p13 = scmp.lt.s32.totalorder %s476_s16, %s476_s16 }
  0xa2   : > { %p2168_p0 = scmp.lt.s32.totalorder %s2166_s28, %s2159_s22 }
  0xa3   : > { %p2162_p11 = pnand %p2160_p10, %p2680_p8 }
  0xa4   : > { %p2169_p2 = por %p2168_p0, %p2167_p13 }
  0xa5   : > { %p2163_p12 = pneg %p2162_p11 }
  0xa7   : > { %p2170_p5 = pnand %p2169_p2, %p2163_p12 }
  0xa9   : > { %2173 = shalt.err (!%p2170_p5)
}
  0xaa   : > { %1898 = dma.hbm_to_vmem [thread:$0]  (!%p2664_p6), %s3281_s9, 16, %s476_s16, [#allocation18]  }
  0xab   : > { %s2529_s24 = smov [#allocation13]   ;;  %s3282_s6 = sld [smem:[#allocation43_spill]] }
  0xac   : > { %s437_s2 = sshll.u32 %s2529_s24, 4  ;;  %s438_s2 = int_to_ptr.vmem [resolvable:$true] %s437_s2 }
  0xb1   : > { %s2174_s17 = scalar_lea.hbm %s3282_s6, 256 }
  0xb2   : > { %p2175_p7 = scmp.ne.s32.totalorder %s3282_s6, %s2174_s17  ;;  %p2181_p1 = scmp.lt.u32.totalorder %s2174_s17, %s3282_s6 }
  0xb4   : > { %p2177_p9 = pnand %p2175_p7, %p2680_p8 }
  0xb6   : > { %p2178_p4 = pneg %p2177_p9 }
  0xb8   : > { %p2183_p3 = pnand %p2181_p1, %p2178_p4 }
  0xba   : > { %2186 = shalt.err (!%p2183_p3)
}
  0xbb   : > { %s2187_s16 = scalar_lea.vmem %s438_s2, 256  ;;  %p2195_p13 = scmp.lt.s32.totalorder %s438_s2, %s438_s2 }
  0xbc   : > { %p2188_p10 = scmp.ne.s32.totalorder %s438_s2, %s2187_s16  ;;  %p2196_p0 = scmp.lt.s32.totalorder %s2187_s16, %s2187_s16 }
  0xbe   : > { %p2190_p11 = pnand %p2188_p10, %p2680_p8  ;;  %p2197_p2 = por %p2196_p0, %p2195_p13 }
  0xc0   : > { %p2191_p12 = pneg %p2190_p11 }
  0xc2   : > { %p2198_p5 = pnand %p2197_p2, %p2191_p12 }
  0xc4   : > { %2201 = shalt.err (!%p2198_p5)
}
  0xc5   : > { %s2530_s28 = smov 64   ;;  %s2531_s12 = smov 4  }
  0xc6   : > { %1889 = dma.hbm_to_vmem [thread:$0]  (!%p2664_p6), %s3282_s6, 256, %s438_s2, [#allocation12], %s2530_s28, %s2530_s28, %s2531_s12  }
  0xc7   : > { %s2532_s21 = smov [#allocation16]   ;;  %s2533_s17 = smov [#allocation19]  }
  0xc8   : > { %s461_s23 = sshll.u32 %s2532_s21, 4  ;;  %s485_s19 = sshll.u32 %s2533_s17, 4  ;;  %s462_s23 = int_to_ptr.vmem [resolvable:$true] %s461_s23  ;;  %s2801_s19 = int_to_ptr.vmem [resolvable:$true] %s485_s19 }
  0xc9   : > { %s3283_s8 = sld [smem:[#allocation45_spill]] }
  0xcf   : > { %s2202_s22 = scalar_lea.hbm %s3283_s8, 256 }
  0xd0   : > { %p2203_p7 = scmp.ne.s32.totalorder %s3283_s8, %s2202_s22  ;;  %p2209_p1 = scmp.lt.u32.totalorder %s2202_s22, %s3283_s8 }
  0xd2   : > { %p2205_p9 = pnand %p2203_p7, %p2680_p8 }
  0xd4   : > { %p2206_p4 = pneg %p2205_p9 }
  0xd6   : > { %p2211_p3 = pnand %p2209_p1, %p2206_p4 }
  0xd8   : > { %2214 = shalt.err (!%p2211_p3)
}
  0xd9   : > { %s2215_s24 = scalar_lea.vmem %s462_s23, 256  ;;  %p2223_p13 = scmp.lt.s32.totalorder %s462_s23, %s462_s23 }
  0xda   : > { %p2216_p10 = scmp.ne.s32.totalorder %s462_s23, %s2215_s24  ;;  %p2224_p0 = scmp.lt.s32.totalorder %s2215_s24, %s2215_s24 }
  0xdc   : > { %p2218_p11 = pnand %p2216_p10, %p2680_p8  ;;  %p2225_p2 = por %p2224_p0, %p2223_p13 }
  0xde   : > { %p2219_p12 = pneg %p2218_p11 }
  0xe0   : > { %p2226_p5 = pnand %p2225_p2, %p2219_p12 }
  0xe2   : > { %2229 = shalt.err (!%p2226_p5)
}
  0xe3   : > { %1895 = dma.hbm_to_vmem [thread:$0]  (!%p2664_p6), %s3283_s8, 256, %s462_s23, [#allocation15], %s2530_s28, %s2530_s28, %s2531_s12  }
  0xe4   : > { %s3284_s10 = sld [smem:[#allocation47_spill]] }
  0xea   : > { %s2230_s3 = scalar_lea.hbm %s3284_s10, 256 }
  0xeb   : > { %p2231_p7 = scmp.ne.s32.totalorder %s3284_s10, %s2230_s3  ;;  %p2237_p1 = scmp.lt.u32.totalorder %s2230_s3, %s3284_s10 }
  0xed   : > { %p2233_p9 = pnand %p2231_p7, %p2680_p8 }
  0xef   : > { %p2234_p4 = pneg %p2233_p9 }
  0xf1   : > { %p2239_p3 = pnand %p2237_p1, %p2234_p4 }
  0xf3   : > { %2242 = shalt.err (!%p2239_p3)
}
  0xf4   : > { %s2243_s23 = scalar_lea.vmem %s2801_s19, 256  ;;  %p2251_p13 = scmp.lt.s32.totalorder %s2801_s19, %s2801_s19 }
  0xf5   : > { %p2244_p10 = scmp.ne.s32.totalorder %s2801_s19, %s2243_s23  ;;  %p2252_p0 = scmp.lt.s32.totalorder %s2243_s23, %s2243_s23 }
  0xf7   : > { %p2246_p11 = pnand %p2244_p10, %p2680_p8  ;;  %p2253_p2 = por %p2252_p0, %p2251_p13 }
  0xf9   : > { %p2247_p12 = pneg %p2246_p11 }
  0xfb   : > { %p2254_p5 = pnand %p2253_p2, %p2247_p12 }
  0xfd   : > { %2257 = shalt.err (!%p2254_p5)
}
  0xfe   : > { %1901 = dma.hbm_to_vmem [thread:$0]  (!%p2664_p6), %s3284_s10, 256, %s2801_s19, [#allocation18], %s2530_s28, %s2530_s28, %s2531_s12  }
  0xff   : > { %s2534_s21 = smov [#allocation20]   ;;  %s2258_s22 = scalar_lea.hbm %s3245_s11, 16 }
 0x100   : > { %s499_s17 = sshll.u32 %s2534_s21, 4  ;;  %p2259_p7 = scmp.ne.s32.totalorder %s3245_s11, %s2258_s22  ;;  %s500_s17 = int_to_ptr.vmem [resolvable:$true] %s499_s17 }
 0x101   : > { %p2265_p1 = scmp.lt.u32.totalorder %s2258_s22, %s3245_s11 }
 0x102   : > { %p2261_p9 = pnand %p2259_p7, %p2680_p8 }
 0x104   : > { %p2262_p4 = pneg %p2261_p9 }
 0x106   : > { %p2267_p3 = pnand %p2265_p1, %p2262_p4 }
 0x108   : > { %2270 = shalt.err (!%p2267_p3)
}
 0x109   : > { %s2271_s28 = scalar_lea.vmem %s500_s17, 16  ;;  %s2278_s12 = scalar_lea.vmem %s500_s17, 32 }
 0x10a   : > { %p2272_p10 = scmp.ne.s32.totalorder %s500_s17, %s2271_s28  ;;  %p2279_p13 = scmp.lt.s32.totalorder %s500_s17, %s500_s17 }
 0x10b   : > { %p2280_p0 = scmp.lt.s32.totalorder %s2278_s12, %s2271_s28 }
 0x10c   : > { %p2274_p11 = pnand %p2272_p10, %p2680_p8 }
 0x10d   : > { %p2281_p2 = por %p2280_p0, %p2279_p13 }
 0x10e   : > { %p2275_p12 = pneg %p2274_p11 }
 0x110   : > { %p2282_p5 = pnand %p2281_p2, %p2275_p12 }
 0x112   : > { %2285 = shalt.err (!%p2282_p5)
}
 0x113   : > { %1904 = dma.hbm_to_vmem [thread:$0]  (!%p2664_p6), %s3245_s11, 16, %s500_s17, [#allocation21]  }
 0x114   : > { %s1674_s18 = sadd.s32 4294967294, %s2522_s30   ;;  %s55_s4 = sadd.s32 1, %s2518_s29 }
 0x115   : > { %s64_s20 = sadd.s32 1, %s2510_s27  ;;  %p57_p8 = scmp.ge.s32.totalorder %s55_s4, 2 }
 0x116   : > { %p71_p7 = scmp.ne.s32.totalorder %s2510_s27, %s2506_s26  ;;  %p72_p9 = scmp.eq.s32.totalorder %s2522_s30, 0 }
 0x117   : > { %p77_p4 = scmp.ne.s32.totalorder %s2506_s26, %s2502_s25  ;;  %s3326_s4 = smov (%p57_p8, %s55_s4), 0 }
 0x118   : > { %p2878_p1 = por %p72_p9, %p71_p7  ;;  %p3286_p3 = scmp.eq.s32.totalorder %s2650_s14, 0 }
 0x119   : > { %s59_s15 = ssub.s32 %s2518_s29, %s3326_s4  ;;  %p349_p10 = scmp.eq.s32.totalorder %s2650_s14, 1 }
 0x11a   : > { %p2884_p6 = por %p3286_p3, %p77_p4  ;;  %p62_p11 = scmp.eq.s32.totalorder %s59_s15, 0 }
 0x11b   : > { %p355_p12 = scmp.eq.s32.totalorder %s1674_s18, 1  ;;  %p2891_p13 = por %p349_p10, %p71_p7 }
 0x11c   : > { %s3287_s17 = scalar_select %p2884_p6, 1, 0 }
 0x11d   : > { %s3288_s3 = scalar_select %p2891_p13, 1, 0 }
 0x11e   : > { %p1931_p0 = scmp.lt.s32.totalorder %s2522_s30, 2  ;;  %p2899_p2 = por %p355_p12, %p77_p4 }
 0x11f   : > { %s2897_s22 = scalar_select %p62_p11, %s2510_s27, %s64_s20  }
 0x120   : > { %s3289_s16 = scalar_select %p2899_p2, 1, 0 }
 0x121   : > { %s2904_s13 = sand.u32 1, %s2510_s27   ;;  %s1687_s23 = sshll.u32 %s2518_s29, 7 }
 0x122   : > { %s3255_s2 = sshll.u32 %s2904_s13, 3  ;;  %s3290_s0 = sld [smem:[#allocation38_spill]] }
 0x123   : > { %s514_s24 = scalar_lea.vmem [#allocation2], %s3255_s2  ;;  %p2919_p5 = pnand %p1931_p0, %p2878_p1 }
 0x124   : > { %s522_s18 = sshll.u32 %s514_s24, 4  ;;  %s2926_s28 = scalar_lea.hbm %s3235_s1, %s1687_s23  ;;  %s2915_s18 = int_to_ptr.vmem [resolvable:$true] %s522_s18 }
 0x125   : > { %s3291_s20 = scalar_select %p2919_p5, 1, 0 }
 0x126   : > { %s511_s6 = scalar_lea.sflag [#allocation3], %s2904_s13  ;;  %p2934_p7 = pneg %p2919_p5 }
 0x128   : > { %s2911_s19 = scalar_lea.hbm %s3290_s0, %s1687_s23  ;;  %s2291_s5 = scalar_lea.hbm %s3290_s0, 256 }
 0x129   : > { %s2286_s7 = scalar_lea.hbm %s2911_s19, 128  ;;  %p2292_p1 = scmp.lt.u32.totalorder %s2911_s19, %s3290_s0 }
 0x12a   : > { %p2287_p8 = scmp.ne.s32.totalorder %s2911_s19, %s2286_s7  ;;  %p2293_p3 = scmp.lt.u32.totalorder %s2291_s5, %s2286_s7 }
 0x12b   : > { %p2295_p11 = scmp.lt.u32.totalorder %s2286_s7, %s2911_s19 }
 0x12c   : > { %p2289_p9 = pnand %p2934_p7, %p2287_p8  ;;  %p2294_p10 = por %p2293_p3, %p2292_p1 }
 0x12e   : > { %p2290_p4 = pneg %p2289_p9  ;;  %p2296_p12 = por %p2295_p11, %p2294_p10 }
 0x130   : > { %p2297_p0 = pnand %p2296_p12, %p2290_p4 }
 0x132   : > { %2300 = shalt.err (!%p2297_p0)
}
 0x133   : > { %s2301_s12 = scalar_lea.vmem %s2915_s18, 128  ;;  %s2535_s2 = smov [#allocation2]  }
 0x134   : > { %p2302_p8 = scmp.ne.s32.totalorder %s2915_s18, %s2301_s12  ;;  %s2306_s21 = sshll.u32 %s2535_s2, 4  ;;  %s2307_s21 = int_to_ptr.vmem [resolvable:$false] %s2306_s21 }
 0x135   : > { %s2308_s15 = scalar_lea.vmem %s2307_s21, 256  ;;  %p2309_p13 = scmp.lt.s32.totalorder %s2915_s18, %s2307_s21 }
 0x136   : > { %p2304_p9 = pnand %p2302_p8, %p2934_p7  ;;  %p2310_p6 = scmp.lt.s32.totalorder %s2308_s15, %s2301_s12 }
 0x138   : > { %p2305_p2 = pneg %p2304_p9  ;;  %p2311_p1 = por %p2310_p6, %p2309_p13 }
 0x13a   : > { %p2312_p3 = pnand %p2311_p1, %p2305_p2 }
 0x13c   : > { %2315 = shalt.err (!%p2312_p3)
}
 0x13d   : > { %1908 = dma.hbm_to_vmem [thread:$0]  (!%p2919_p5), %s2911_s19, 128, %s2915_s18, %s511_s6  }
 0x13e   : > { %s3293_s7 = sshll.u32 %s2904_s13, 3  ;;  %s3294_s12 = sand.u32 1, %s2522_s30  }
 0x13f   : > { %s533_s5 = scalar_lea.vmem [#allocation5], %s3293_s7  ;;  %s530_s2 = scalar_lea.sflag [#allocation6], %s3294_s12 }
 0x140   : > { %s540_s23 = sshll.u32 %s533_s5, 4  ;;  %s2316_s21 = scalar_lea.hbm %s2926_s28, 128  ;;  %s541_s23 = int_to_ptr.vmem [resolvable:$true] %s540_s23 }
 0x141   : > { %p2317_p6 = scmp.ne.s32.totalorder %s2926_s28, %s2316_s21  ;;  %s2321_s8 = scalar_lea.hbm %s3235_s1, 256 }
 0x142   : > { %p2322_p4 = scmp.lt.u32.totalorder %s2926_s28, %s3235_s1  ;;  %p2323_p10 = scmp.lt.u32.totalorder %s2321_s8, %s2316_s21 }
 0x143   : > { %p2319_p13 = pnand %p2317_p6, %p2934_p7  ;;  %p2325_p12 = scmp.lt.u32.totalorder %s2316_s21, %s2926_s28 }
 0x144   : > { %p2324_p11 = por %p2323_p10, %p2322_p4 }
 0x145   : > { %p2320_p2 = pneg %p2319_p13 }
 0x146   : > { %p2326_p0 = por %p2325_p12, %p2324_p11 }
 0x148   : > { %p2327_p8 = pnand %p2326_p0, %p2320_p2 }
 0x14a   : > { %2330 = shalt.err (!%p2327_p8)
}
 0x14b   : > { %s2331_s6 = scalar_lea.vmem %s541_s23, 128  ;;  %s2536_s19 = smov [#allocation5]  }
 0x14c   : > { %p2332_p9 = scmp.ne.s32.totalorder %s541_s23, %s2331_s6  ;;  %s2336_s18 = sshll.u32 %s2536_s19, 4  ;;  %s2337_s18 = int_to_ptr.vmem [resolvable:$false] %s2336_s18 }
 0x14d   : > { %s2338_s0 = scalar_lea.vmem %s2337_s18, 256  ;;  %p2339_p6 = scmp.lt.s32.totalorder %s541_s23, %s2337_s18 }
 0x14e   : > { %p2334_p1 = pnand %p2332_p9, %p2934_p7  ;;  %p2340_p13 = scmp.lt.s32.totalorder %s2338_s0, %s2331_s6 }
 0x150   : > { %p2335_p3 = pneg %p2334_p1  ;;  %p2341_p5 = por %p2340_p13, %p2339_p6 }
 0x152   : > { %p2342_p4 = pnand %p2341_p5, %p2335_p3 }
 0x154   : > { %2345 = shalt.err (!%p2342_p4)
}
 0x155   : > { %p3295_p10 = scmp.ne.s32.totalorder %s3291_s20, 0  ;;  %s1690_s8 = sshll.u32 %s2518_s29, 4 }
 0x156   : > { %s3296_s7 = sld [smem:[#allocation40_spill]]  ;;  %s550_s12 = scalar_lea.vmem [#allocation8], %s2904_s13 }
 0x157   : > { %1911 = dma.hbm_to_vmem [thread:$0]  (!%p3295_p10), %s2926_s28, 128, %s541_s23, %s530_s2  }
 0x158   : > { %s557_s21 = sshll.u32 %s550_s12, 4  ;;  %s3297_s15 = sand.u32 1, %s2522_s30   ;;  %s558_s21 = int_to_ptr.vmem [resolvable:$true] %s557_s21 }
 0x159   : > { %s548_s6 = scalar_lea.sflag [#allocation9], %s3297_s15 }
 0x15c   : > { %s2982_s5 = scalar_lea.hbm %s3296_s7, %s1690_s8  ;;  %s2351_s2 = scalar_lea.hbm %s3296_s7, 32 }
 0x15d   : > { %s2346_s19 = scalar_lea.hbm %s2982_s5, 16  ;;  %p2352_p12 = scmp.lt.u32.totalorder %s2982_s5, %s3296_s7 }
 0x15e   : > { %p2347_p5 = scmp.ne.s32.totalorder %s2982_s5, %s2346_s19  ;;  %p2353_p0 = scmp.lt.u32.totalorder %s2351_s2, %s2346_s19 }
 0x15f   : > { %p2355_p9 = scmp.lt.u32.totalorder %s2346_s19, %s2982_s5 }
 0x160   : > { %p2349_p2 = pnand %p2347_p5, %p2934_p7  ;;  %p2354_p8 = por %p2353_p0, %p2352_p12 }
 0x162   : > { %p2350_p11 = pneg %p2349_p2  ;;  %p2356_p1 = por %p2355_p9, %p2354_p8 }
 0x164   : > { %p2357_p3 = pnand %p2356_p1, %p2350_p11 }
 0x166   : > { %2360 = shalt.err (!%p2357_p3)
}
 0x167   : > { %s2361_s13 = scalar_lea.vmem %s558_s21, 16  ;;  %s2537_s8 = smov [#allocation8]  }
 0x168   : > { %p2362_p6 = scmp.ne.s32.totalorder %s558_s21, %s2361_s13  ;;  %s2366_s9 = sshll.u32 %s2537_s8, 4  ;;  %s2367_s9 = int_to_ptr.vmem [resolvable:$false] %s2366_s9 }
 0x169   : > { %s2368_s10 = scalar_lea.vmem %s2367_s9, 32  ;;  %p2369_p5 = scmp.lt.s32.totalorder %s558_s21, %s2367_s9 }
 0x16a   : > { %p2364_p13 = pnand %p2362_p6, %p2934_p7  ;;  %p2370_p2 = scmp.lt.s32.totalorder %s2368_s10, %s2361_s13 }
 0x16c   : > { %p2365_p4 = pneg %p2364_p13  ;;  %p2371_p10 = por %p2370_p2, %p2369_p5 }
 0x16e   : > { %p2372_p0 = pnand %p2371_p10, %p2365_p4 }
 0x170   : > { %2375 = shalt.err (!%p2372_p0)
}
 0x171   : > { %p3298_p12 = scmp.ne.s32.totalorder %s3291_s20, 0  ;;  %s3299_s12 = sld [smem:[#allocation37_spill]] }
 0x173   : > { %1914 = dma.hbm_to_vmem [thread:$0]  (!%p3298_p12), %s2982_s5, 16, %s558_s21, %s548_s6  }
 0x177   : > { %p3300_p11 = scmp.ne.s32.totalorder %s3299_s12, 0 }
 0x178   : > { %s3007_s24 = sand.u32 (!%p3300_p11), 1, %s2506_s26   ;;  %p3301_p7 = scmp.ne.s32.totalorder (!%p3300_p11), %s3287_s17, 0 }
 0x179   : > { %566 = sbr.rel (%p3300_p11) target bundleno = 2162 (0x872), region = 68  ;;  %s3010_s15 = sshll.u32 (!%p3300_p11), %s3007_s24, 3 }
 0x17a   : > { %s569_s19 = scalar_lea.sflag (!%p3300_p11), [#allocation3], %s3007_s24  ;;  %s572_s28 = scalar_lea.vmem (!%p3300_p11), [#allocation2], %s3010_s15 }
 0x180   : > { %2457 = dma.done.wait (%p3301_p7), %s569_s19, 128  }
 0x181   : > { %2459 = vsyncadd (%p3301_p7), %s569_s19, 4294967168  ;;  %s577_s20 = sand.u32 1, %s2650_s14   ;;  %s581_s21 = scalar_lea.vmem [#allocation5], %s3010_s15 }
 0x182   : > { %s578_s5 = scalar_lea.sflag [#allocation6], %s577_s20 }
 0x183   : > { %2461 = dma.done.wait (%p3301_p7), %s578_s5, 128  }
 0x184   : > { %2463 = vsyncadd (%p3301_p7), %s578_s5, 4294967168  ;;  %p3302_p10 = scmp.eq.s32.totalorder %s2650_s14, 0 }
 0x186   : > { %2465 = dma.done.wait (%p3302_p10), [#allocation6], 128   ;;  %p3303_p8 = pmov %p3302_p10 }
 0x187   : > { %s591_s6 = scalar_lea.sflag [#allocation9], %s577_s20  ;;  %s593_s23 = scalar_lea.vmem [#allocation8], %s3007_s24 }
 0x188   : > { %2467 = vsyncadd (%p3303_p8), [#allocation6], 4294967168 }
 0x189   : > { %2469 = dma.done.wait (%p3301_p7), %s591_s6, 16  }
 0x18a   : > { %2471 = vsyncadd (%p3301_p7), %s591_s6, 4294967280  ;;  %p3304_p9 = pmov %p3303_p8 }
 0x18b   : > { %p3305_p1 = pmov %p3303_p8 }
 0x18c   : > { %2473 = dma.done.wait (%p3304_p9), [#allocation9], 16  }
 0x18d   : > { %2475 = vsyncadd (%p3305_p1), [#allocation9], 4294967280  ;;  %p3306_p3 = pmov %p3305_p1 }
 0x18e   : > { %p3307_p6 = pmov %p3305_p1 }
 0x18f   : > { %2477 = dma.done.wait (%p3306_p3), [#allocation12], 272  }
 0x190   : > { %2479 = vsyncadd (%p3307_p6), [#allocation12], 4294967024  ;;  %p3308_p13 = pmov %p3305_p1 }
 0x191   : > { %p3309_p4 = pmov %p3305_p1 }
 0x192   : > { %2481 = dma.done.wait (%p3308_p13), [#allocation15], 272  }
 0x193   : > { %2483 = vsyncadd (%p3309_p4), [#allocation15], 4294967024  ;;  %p3310_p5 = pmov %p3305_p1 }
 0x194   : > { %p3311_p2 = pmov %p3305_p1 }
 0x195   : > { %2485 = dma.done.wait (%p3310_p5), [#allocation18], 272  }
 0x196   : > { %2487 = vsyncadd (%p3311_p2), [#allocation18], 4294967024  ;;  %p3312_p0 = pmov %p3305_p1 }
 0x198   : > { %2489 = dma.done.wait (%p3312_p0), [#allocation21], 16   ;;  %p3313_p12 = pmov %p3312_p0 }
 0x199   : > { %vm685_vm0 = vcmask 261120   ;;  %v684_v0 = vld [vmem:[%s581_s21] sm:$0xff]  ;;  %v2010_v7 = vld [vmem:[#allocation16] sm:$0xff]   ;;  %v2538_v9 = vmov 0.0   ;;  %v2012_v10 = vld [vmem:[#allocation16 + $0x8] sm:$0xff]   ;;  %vm2539_vm1 = vmmov 0  }
 0x19a   : > { %2491 = vsyncadd (%p3313_p12), [#allocation21], 4294967280  ;;  %v686_v1 = vsel %vm685_vm0, %v684_v0, 0.0  ;;  %v2011_v8 = vld [vmem:[#allocation13] sm:$0xff]   ;;  %1759 = vmatprep.subr.bf16.mxu0 %v2538_v9  ;;  %1767 = vmatprep.subr.bf16.mxu1 %v2538_v9  ;;  %v2013_v11 = vld [vmem:[#allocation13 + $0x8] sm:$0xff]   ;;  %vm872_vm2 = vcmask 64512  }
 0x19b   : > { %687 = vadd.xlane.f32.xlu0 %v686_v1  ;;  %1760 = vmatpush3.bf16.msra.mxu0 %v2010_v7  ;;  %v1705_v16 = vld [vmem:[#allocation10] ss:$0 sm:$0xff]  ;;  %v1706_v18 = vld [vmem:[#allocation11] ss:$0 sm:$0xff]  ;;  %v1707_v22 = vld [vmem:[#allocation17] ss:$0 sm:$0xff] }
 0x19c   : > { %1768 = vmatpush3.bf16.msra.mxu1 %v2011_v8  ;;  %1761 = vmatprep.subr.bf16.mxu0 %v2538_v9  ;;  %v1711_v23 = vld [vmem:[#allocation14] ss:$0 sm:$0xff]  ;;  %s2540_s14 = smov 120   ;;  %s2541_s17 = smov 112   ;;  %v863_v47 = vld [vmem:[#allocation7] sm:$0xff]  ;;  %vm1110_vm3 = vcmask 1043456  }
 0x19d   : > { %1769 = vmatprep.subr.bf16.mxu1 %v2538_v9  ;;  %1763 = vmatprep.mubr.msk.bf16.mxu0 %vm2539_vm1, %v2538_v9  ;;  %s2542_s2 = smov 104   ;;  %v1715_v48 = vld [vmem:[%s593_s23] ss:$0 sm:$0xff]  ;;  %s2543_s18 = smov 96   ;;  %vm1314_vm4 = vcmask 130048   ;;  %vm1317_vm5 = vcmask 195584  }
 0x19e   : > { %1771 = vmatprep.mubr.msk.bf16.mxu1 %vm2539_vm1, %v2538_v9  ;;  %v871_v49 = vadd.f32 %v1715_v48, %v863_v47  ;;  %s681_s0 = scalar_lea.vmem [#allocation23], %s3010_s15  ;;  %s2544_s13 = smov 8  }
 0x19f   : > { %1762 = vmatpush3.bf16.msra.mxu0 %v2012_v10  ;;  %s2545_s8 = smov 16   ;;  %s3314_s9 = sld [smem:[#allocation36_spill]] }
 0x1a0   : > { %1770 = vmatpush3.bf16.msra.mxu1 %v2013_v11  ;;  %1775 = vmatprep.subr.bf16.mxu0 %v2538_v9  ;;  %s2546_s10 = smov 24   ;;  %s3315_s5 = sld [smem:[#allocation49_spill]] }
 0x1a1   : > { %1781 = vmatprep.subr.bf16.mxu1 %v2538_v9  ;;  %s1430_s6 = sshll.u32 %s681_s0, 4  ;;  %s1402_s23 = scalar_lea.sflag [#allocation24], %s3007_s24  ;;  %s1431_s6 = int_to_ptr.vmem [resolvable:$true] %s1430_s6 }
 0x1a2   : > { %p3316_p7 = scmp.ne.s32.totalorder %s3288_s3, 0 }
 0x1a5   : > { %s1730_s12 = sshll.u32 %s3314_s9, 7 }
 0x1a6   : > { %s3154_s21 = scalar_lea.hbm %s3315_s5, %s1730_s12 }
 0x228   : > { %v688_v2 = vpop.xlane.xlu0 %687 }
 0x229   : > { %v690_v3 = vmul.f32 0.03125, %v688_v2 }
 0x22b   : > { %v691_v4 = vsub.f32 %v684_v0, %v690_v3 }
 0x22d   : > { %v692_v5 = vmul.f32 %v691_v4, %v691_v4 }
 0x22f   : > { %v693_v6 = vsel %vm685_vm0, %v692_v5, 0.0 }
 0x230   : > { %694 = vadd.xlane.f32.xlu0 %v693_v6 }
 0x2bd   : > { %v695_v12 = vpop.xlane.xlu0 %694 }
 0x2be   : > { %v696_v13 = vmul.f32 0.03125, %v695_v12 }
 0x2c0   : > { %v697_v14 = vadd.f32 1e-05, %v696_v13 }
 0x2c2   : > { %2016 = vrsqrt.f32 %v697_v14 }
 0x2cc   : > { %v2017_v15 = vpop.eup %2016 }
 0x2cd   : > { %v699_v17 = vmul.f32 %v2017_v15, %v691_v4 }
 0x2cf   : > { %v707_v19 = vmul.f32 %v1705_v16, %v699_v17 }
 0x2d1   : > { %v715_v20 = vadd.f32 %v1706_v18, %v707_v19 }
 0x2d3   : > { %v716_v21 = vpack.c.bf16 %v715_v20, %v715_v20 }
 0x2d5   : > { %1764 = vmatmul.mubr.msk.bf16.vlgmr.msra.gmra.mrb[0].mxu0 %vm685_vm0, %v716_v21  ;;  %1772 = vmatmul.mubr.msk.bf16.vlgmr.msra.gmra.mrb[0].mxu1 %vm685_vm0, %v716_v21 }
 0x2d6   : > { %1777 = vmatprep.mubr.msk.bf16.mxu0 %vm2539_vm1, %v2538_v9  ;;  %1783 = vmatprep.mubr.msk.bf16.mxu1 %vm2539_vm1, %v2538_v9 }
 0x3a8   : > { %v777_v24 = vpop.f32.mrb[0].mxu0  ;;  %v840_v25 = vpop.f32.mrb[0].mxu1 }
 0x3a9   : > { %v778_v26 = vadd.f32 %v1707_v22, %v777_v24  ;;  %v841_v27 = vadd.f32 %v1711_v23, %v840_v25  ;;  %v1765_v28 = vpop.f32.mrb[1].mxu0  ;;  %v1773_v29 = vpop.f32.mrb[1].mxu1 }
 0x3aa   : > { %v780_v30 = vpop.f32.mrb[2].mxu0  ;;  %v843_v31 = vpop.f32.mrb[2].mxu1 }
 0x3ab   : > { %v3071_v32 = vpack.c.bf16 %v778_v26, %v778_v26  ;;  %v846_v33 = vmul.f32 0.35355338, %v841_v27  ;;  %v1766_v34 = vpop.f32.mrb[3].mxu0  ;;  %v1774_v35 = vpop.f32.mrb[3].mxu1 }
 0x3ad   : > { %v847_v36 = vpack.c.bf16 %v846_v33, %v846_v33  ;;  %857 = vrot.lane.b32.xlu1 %v3071_v32, %s2540_s14  ;;  %v877_v37 = vsel %vm872_vm2, %v3071_v32, 0 }
 0x3ae   : > { %1776 = vmatpush3.bf16.xpose.msra.mxu0 %v877_v37 }
 0x3af   : > { %850 = vrot.lane.b32.xlu0 %v847_v36, %s2540_s14  ;;  %1787 = vmatprep.subr.bf16.mxu0 %v2538_v9  ;;  %s2376_s14 = scalar_lea.vmem %s1431_s6, 128 }
 0x3b0   : > { %p2377_p11 = scmp.ne.s32.totalorder %s1431_s6, %s2376_s14 }
 0x3b1   : > { %859 = vrot.lane.b32.xlu1 %v3071_v32, %s2541_s17 }
 0x3b2   : > { %p2378_p10 = pnand %p2377_p11, %p3316_p7 }
 0x3b4   : > { %p2379_p8 = pneg %p2378_p10 }
 0x3b5   : > { %861 = vrot.lane.b32.xlu1 %v3071_v32, %s2542_s2  ;;  %1778 = vmatmul.mubr.msk.bf16.vlgmr.msra.gmra.mrb[4].mxu0 %vm872_vm2, %v847_v36 }
 0x3b6   : > { %1789 = vmatprep.mubr.msk.bf16.mxu0 %vm2539_vm1, %v2538_v9 }
 0x3b9   : > { %852 = vrot.lane.b32.xlu1 %v847_v36, %s2541_s17  ;;  %s2547_s17 = smov [#allocation23]  }
 0x3bd   : > { %854 = vrot.lane.b32.xlu1 %v847_v36, %s2542_s2  ;;  %s2380_s2 = sshll.u32 %s2547_s17, 4  ;;  %s2381_s2 = int_to_ptr.vmem [resolvable:$false] %s2380_s2 }
 0x3be   : > { %p2383_p9 = scmp.lt.s32.totalorder %s1431_s6, %s2381_s2 }
 0x41f   : > { %v858_v38 = vpop.permute.xlu1 %857 }
 0x420   : > { %v923_v39 = vsel %vm872_vm2, %v858_v38, 0 }
 0x421   : > { %1782 = vmatpush3.bf16.xpose.msra.mxu1 %v923_v39  ;;  %v851_v42 = vpop.permute.xlu0 %850 }
 0x422   : > { %1793 = vmatprep.subr.bf16.mxu1 %v2538_v9 }
 0x423   : > { %v3084_v40 = vpop.permute.xlu1 %859 }
 0x424   : > { %v969_v41 = vsel %vm872_vm2, %v3084_v40, 0 }
 0x425   : > { %1788 = vmatpush3.bf16.xpose.msra.mxu0 %v969_v41 }
 0x426   : > { %1799 = vmatprep.subr.bf16.mxu0 %v2538_v9 }
 0x427   : > { %v3089_v43 = vpop.permute.xlu1 %861 }
 0x428   : > { %v1015_v44 = vsel %vm872_vm2, %v3089_v43, 0  ;;  %1784 = vmatmul.mubr.msk.bf16.vlgmr.msra.gmra.mrb[4].mxu1 %vm872_vm2, %v851_v42 }
 0x429   : > { %1794 = vmatpush3.bf16.xpose.msra.mxu1 %v1015_v44  ;;  %1795 = vmatprep.mubr.msk.bf16.mxu1 %vm2539_vm1, %v2538_v9 }
 0x42a   : > { %1805 = vmatprep.subr.bf16.mxu1 %v2538_v9 }
 0x42b   : > { %v853_v45 = vpop.permute.xlu1 %852 }
 0x42c   : > { %1790 = vmatmul.mubr.msk.bf16.vlgmr.msra.gmra.mrb[8].mxu0 %vm872_vm2, %v853_v45 }
 0x42d   : > { %1801 = vmatprep.mubr.msk.bf16.mxu0 %vm2539_vm1, %v2538_v9 }
 0x42f   : > { %v855_v46 = vpop.permute.xlu1 %854 }
 0x430   : > { %1796 = vmatmul.mubr.msk.bf16.vlgmr.msra.gmra.mrb[8].mxu1 %vm872_vm2, %v855_v46 }
 0x431   : > { %1807 = vmatprep.mubr.msk.bf16.mxu1 %vm2539_vm1, %v2538_v9 }
 0x488   : > { %v913_v50 = vpop.f32.mrb[4].mxu0 }
 0x489   : > { %v914_v51 = vadd.f32 %v913_v50, %v871_v49  ;;  %v1779_v52 = vpop.f32.mrb[5].mxu0 }
 0x48a   : > { %v916_v53 = vpop.f32.mrb[6].mxu0 }
 0x48b   : > { %v1780_v54 = vpop.f32.mrb[7].mxu0  ;;  %v1057_v55 = vsel %vm872_vm2, %v914_v51, -inf }
 0x48c   : > { %1058 = vmax.xlane.f32.xlu1 %v1057_v55 }
 0x4fb   : > { %v959_v56 = vpop.f32.mrb[4].mxu1 }
 0x4fc   : > { %v960_v57 = vadd.f32 %v959_v56, %v871_v49  ;;  %v1785_v58 = vpop.f32.mrb[5].mxu1 }
 0x4fd   : > { %v962_v59 = vpop.f32.mrb[6].mxu1 }
 0x4fe   : > { %v1786_v60 = vpop.f32.mrb[7].mxu1  ;;  %v1060_v61 = vsel %vm872_vm2, %v960_v57, -inf }
 0x4ff   : > { %1061 = vmax.xlane.f32.xlu0 %v1060_v61  ;;  %v1005_v62 = vpop.f32.mrb[8].mxu0 }
 0x500   : > { %v1006_v63 = vadd.f32 %v1005_v62, %v871_v49  ;;  %v1791_v0 = vpop.f32.mrb[9].mxu0 }
 0x501   : > { %v1008_v1 = vpop.f32.mrb[10].mxu0 }
 0x502   : > { %v1792_v2 = vpop.f32.mrb[11].mxu0  ;;  %v1063_v3 = vsel %vm872_vm2, %v1006_v63, -inf }
 0x503   : > { %v1051_v4 = vpop.f32.mrb[8].mxu1  ;;  %1064 = vmax.xlane.f32.xlu1 %v1063_v3  ;;  %v2014_v3 = vld [vmem:[#allocation19] sm:$0xff]  }
 0x504   : > { %v1052_v5 = vadd.f32 %v1051_v4, %v871_v49  ;;  %v1797_v6 = vpop.f32.mrb[9].mxu1  ;;  %v2015_v4 = vld [vmem:[#allocation19 + $0x8] sm:$0xff]  }
 0x505   : > { %v1054_v7 = vpop.f32.mrb[10].mxu1 }
 0x506   : > { %v1798_v8 = vpop.f32.mrb[11].mxu1  ;;  %v1066_v10 = vsel %vm872_vm2, %v1052_v5, -inf }
 0x507   : > { %1067 = vmax.xlane.f32.xlu1 %v1066_v10 }
 0x515   : > { %1105 = vrot.lane.b32.xlu0 %v3071_v32, %s2543_s18 }
 0x518   : > { %1154 = vrot.lane.b32.xlu1 %v858_v38, %s2543_s18 }
 0x519   : > { %v1059_v11 = vpop.xlane.xlu1 %1058 }
 0x51a   : > { %v1069_v12 = vsub.f32 %v914_v51, %v1059_v11 }
 0x51c   : > { %v1073_v13 = vmul.f32 1.442695, %v1069_v12 }
 0x51e   : > { %2018 = vpow2.f32 %v1073_v13 }
 0x528   : > { %v2019_v14 = vpop.eup %2018 }
 0x529   : > { %v1081_v15 = vsel %vm872_vm2, %v2019_v14, 0.0 }
 0x534   : > { %1082 = vadd.xlane.f32.xlu0 %v1081_v15 }
 0x58c   : > { %v1062_v16 = vpop.xlane.xlu0 %1061 }
 0x58d   : > { %v1070_v17 = vsub.f32 %v960_v57, %v1062_v16 }
 0x58f   : > { %v1075_v18 = vmul.f32 1.442695, %v1070_v17 }
 0x590   : > { %v1106_v19 = vpop.permute.xlu0 %1105  ;;  %v1065_v20 = vpop.xlane.xlu1 %1064 }
 0x591   : > { %2020 = vpow2.f32 %v1075_v18  ;;  %v1112_v21 = vsel %vm1110_vm3, %v1106_v19, 0  ;;  %v1071_v22 = vsub.f32 %v1006_v63, %v1065_v20 }
 0x592   : > { %1800 = vmatpush3.bf16.msra.mxu0 %v1112_v21 }
 0x593   : > { %v1077_v23 = vmul.f32 1.442695, %v1071_v22  ;;  %1811 = vmatprep.subr.bf16.mxu0 %v2538_v9 }
 0x594   : > { %v1068_v24 = vpop.xlane.xlu1 %1067 }
 0x595   : > { %2022 = vpow2.f32 %v1077_v23  ;;  %v1072_v25 = vsub.f32 %v1052_v5, %v1068_v24 }
 0x597   : > { %v1079_v26 = vmul.f32 1.442695, %v1072_v25 }
 0x598   : > { %v1155_v27 = vpop.permute.xlu1 %1154 }
 0x599   : > { %2024 = vpow2.f32 %v1079_v26  ;;  %v1160_v28 = vsel %vm1110_vm3, %v1155_v27, 0 }
 0x59a   : > { %1806 = vmatpush3.bf16.msra.mxu1 %v1160_v28 }
 0x59b   : > { %v2021_v29 = vpop.eup %2020  ;;  %1817 = vmatprep.subr.bf16.mxu1 %v2538_v9 }
 0x59c   : > { %v1084_v30 = vsel %vm872_vm2, %v2021_v29, 0.0 }
 0x59d   : > { %1085 = vadd.xlane.f32.xlu1 %v1084_v30 }
 0x59f   : > { %v2023_v31 = vpop.eup %2022 }
 0x5a0   : > { %v1087_v32 = vsel %vm872_vm2, %v2023_v31, 0.0 }
 0x5a1   : > { %1088 = vadd.xlane.f32.xlu0 %v1087_v32 }
 0x5a3   : > { %v2025_v33 = vpop.eup %2024 }
 0x5a4   : > { %v1090_v34 = vsel %vm872_vm2, %v2025_v33, 0.0 }
 0x5a5   : > { %1091 = vadd.xlane.f32.xlu1 %v1090_v34 }
 0x5b6   : > { %1202 = vrot.lane.b32.xlu1 %v3084_v40, %s2543_s18 }
 0x5b7   : > { %1250 = vrot.lane.b32.xlu0 %v3089_v43, %s2543_s18  ;;  %s2382_s18 = scalar_lea.vmem %s2381_s2, 256 }
 0x5b8   : > { %p2384_p1 = scmp.lt.s32.totalorder %s2382_s18, %s2376_s14 }
 0x5ba   : > { %p2385_p3 = por %p2384_p1, %p2383_p9 }
 0x5bc   : > { %p2386_p6 = pnand %p2385_p3, %p2379_p8 }
 0x5c1   : > { %v1083_v35 = vpop.xlane.xlu0 %1082 }
 0x5c2   : > { %2026 = vrcp.f32 %v1083_v35 }
 0x5cc   : > { %v2027_v36 = vpop.eup %2026 }
 0x5cd   : > { %v1097_v37 = vmul.f32 %v2027_v36, %v2019_v14 }
 0x5cf   : > { %v1101_v38 = vpack.c.bf16 %v1097_v37, %v1097_v37  ;;  %v1387_v52 = vsel %vm872_vm2, %v1097_v37, 0.0 }
 0x5d1   : > { %1802 = vmatmul.mubr.msk.bf16.vlgmr.msra.gmra.mrb[12].mxu0 %vm872_vm2, %v1101_v38 }
 0x5d2   : > { %1813 = vmatprep.mubr.msk.bf16.mxu0 %vm2539_vm1, %v2538_v9 }
 0x62a   : > { %v1086_v39 = vpop.xlane.xlu1 %1085 }
 0x62b   : > { %2028 = vrcp.f32 %v1086_v39 }
 0x62e   : > { %v1089_v41 = vpop.xlane.xlu0 %1088 }
 0x62f   : > { %2030 = vrcp.f32 %v1089_v41 }
 0x632   : > { %v1092_v42 = vpop.xlane.xlu1 %1091  ;;  %v1251_v43 = vpop.permute.xlu0 %1250 }
 0x633   : > { %2032 = vrcp.f32 %v1092_v42  ;;  %v1256_v51 = vsel %vm1110_vm3, %v1251_v43, 0 }
 0x635   : > { %v2029_v40 = vpop.eup %2028 }
 0x636   : > { %v1098_v44 = vmul.f32 %v2029_v40, %v2021_v29  ;;  %v1203_v45 = vpop.permute.xlu1 %1202 }
 0x637   : > { %v1208_v46 = vsel %vm1110_vm3, %v1203_v45, 0 }
 0x638   : > { %1812 = vmatpush3.bf16.msra.mxu0 %v1208_v46  ;;  %v1102_v47 = vpack.c.bf16 %v1098_v44, %v1098_v44  ;;  %v1388_v49 = vsel %vm872_vm2, %v1098_v44, 0.0 }
 0x639   : > { %v2031_v48 = vpop.eup %2030  ;;  %1823 = vmatprep.subr.bf16.mxu0 %v2538_v9  ;;  %v1389_v56 = vadd.f32 %v1388_v49, %v1387_v52 }
 0x63a   : > { %v1099_v50 = vmul.f32 %v2031_v48, %v2023_v31  ;;  %1808 = vmatmul.mubr.msk.bf16.vlgmr.msra.gmra.mrb[12].mxu1 %vm872_vm2, %v1102_v47 }
 0x63b   : > { %1818 = vmatpush3.bf16.msra.mxu1 %v1256_v51  ;;  %1819 = vmatprep.mubr.msk.bf16.mxu1 %vm2539_vm1, %v2538_v9 }
 0x63c   : > { %v1390_v53 = vsel %vm872_vm2, %v1099_v50, 0.0  ;;  %v1103_v54 = vpack.c.bf16 %v1099_v50, %v1099_v50 }
 0x63d   : > { %v2033_v55 = vpop.eup %2032  ;;  %v1391_v58 = vadd.f32 %v1390_v53, %v1389_v56 }
 0x63e   : > { %v1100_v57 = vmul.f32 %v2033_v55, %v2025_v33  ;;  %1814 = vmatmul.mubr.msk.bf16.vlgmr.msra.gmra.mrb[16].mxu0 %vm872_vm2, %v1103_v54 }
 0x63f   : > { %1827 = vmatprep.mubr.msk.bf16.mxu0 %vm2539_vm1, %v2538_v9  ;;  %1824 = vmatpush3.bf16.msra.mxu0 %v2014_v3 }
 0x640   : > { %v1392_v59 = vsel %vm872_vm2, %v1100_v57, 0.0  ;;  %v1104_v60 = vpack.c.bf16 %v1100_v57, %v1100_v57  ;;  %1825 = vmatprep.subr.bf16.mxu0 %v2538_v9 }
 0x641   : > { %v1393_v61 = vadd.f32 %v1392_v59, %v1391_v58 }
 0x642   : > { %1820 = vmatmul.mubr.msk.bf16.vlgmr.msra.gmra.mrb[16].mxu1 %vm872_vm2, %v1104_v60 }
 0x643   : > { %v1394_v62 = vmul.f32 0.25, %v1393_v61  ;;  %1826 = vmatpush3.bf16.msra.mxu0 %v2015_v4 }
 0x645   : > { %1395 = vst.msk [vmem:[%s681_s0] sm:$0xff] %vm872_vm2, %v1394_v62 }
 0x6a4   : > { %v1148_v63 = vpop.f32.mrb[12].mxu0 }
 0x6a5   : > { %v1803_v0 = vpop.f32.mrb[13].mxu0  ;;  %v1298_v21 = vpack.c.bf16 %v1148_v63, %v1148_v63 }
 0x6a6   : > { %v1151_v1 = vpop.f32.mrb[14].mxu0 }
 0x6a7   : > { %v1804_v2 = vpop.f32.mrb[15].mxu0 }
 0x70d   : > { %v1196_v5 = vpop.f32.mrb[12].mxu1 }
 0x70e   : > { %v1299_v6 = vpack.c.bf16 %v1196_v5, %v1196_v5  ;;  %v1809_v7 = vpop.f32.mrb[13].mxu1 }
 0x70f   : > { %v1199_v8 = vpop.f32.mrb[14].mxu1 }
 0x710   : > { %1303 = vrot.lane.b32.xlu1 %v1299_v6, %s2544_s13  ;;  %v1810_v10 = vpop.f32.mrb[15].mxu1 }
 0x711   : > { %v1244_v11 = vpop.f32.mrb[16].mxu0 }
 0x712   : > { %v1300_v12 = vpack.c.bf16 %v1244_v11, %v1244_v11  ;;  %v1815_v13 = vpop.f32.mrb[17].mxu0 }
 0x713   : > { %v1247_v14 = vpop.f32.mrb[18].mxu0 }
 0x714   : > { %1306 = vrot.lane.b32.xlu0 %v1300_v12, %s2545_s8  ;;  %v1816_v15 = vpop.f32.mrb[19].mxu0 }
 0x715   : > { %v1292_v16 = vpop.f32.mrb[16].mxu1 }
 0x716   : > { %v1301_v17 = vpack.c.bf16 %v1292_v16, %v1292_v16  ;;  %v1821_v9 = vpop.f32.mrb[17].mxu1 }
 0x717   : > { %v1295_v18 = vpop.f32.mrb[18].mxu1 }
 0x718   : > { %1309 = vrot.lane.b32.xlu1 %v1301_v17, %s2546_s10  ;;  %v1822_v19 = vpop.f32.mrb[19].mxu1 }
 0x782   : > { %v1304_v20 = vpop.permute.xlu1 %1303 }
 0x783   : > { %v1313_v23 = vsel %vm872_vm2, %v1298_v21, %v1304_v20 }
 0x786   : > { %v1307_v22 = vpop.permute.xlu0 %1306 }
 0x787   : > { %v1316_v24 = vsel %vm1314_vm4, %v1313_v23, %v1307_v22 }
 0x78a   : > { %v1310_v25 = vpop.permute.xlu1 %1309 }
 0x78b   : > { %v1319_v26 = vsel %vm1317_vm5, %v1316_v24, %v1310_v25 }
 0x78c   : > { %1828 = vmatmul.mubr.msk.bf16.vlgmr.msra.gmra.mrb[20].mxu0 %vm685_vm0, %v1319_v26 }
 0x78d   : > { %2389 = shalt.err (!%p2386_p6)
}
 0x78e   : > { %s2390_s0 = scalar_lea.hbm %s3154_s21, 128  ;;  %s2394_s10 = scalar_lea.hbm %s3315_s5, 256 }
 0x78f   : > { %p2391_p13 = scmp.ne.s32.totalorder %s3154_s21, %s2390_s0  ;;  %p2395_p2 = scmp.lt.u32.totalorder %s3154_s21, %s3315_s5 }
 0x790   : > { %p2396_p0 = scmp.lt.u32.totalorder %s2394_s10, %s2390_s0  ;;  %p2398_p11 = scmp.lt.u32.totalorder %s2390_s0, %s3154_s21 }
 0x791   : > { %p2392_p4 = pnand %p2391_p13, %p3316_p7 }
 0x792   : > { %p2397_p12 = por %p2396_p0, %p2395_p2 }
 0x793   : > { %p2393_p5 = pneg %p2392_p4 }
 0x794   : > { %p2399_p10 = por %p2398_p11, %p2397_p12 }
 0x796   : > { %p2400_p8 = pnand %p2399_p10, %p2393_p5 }
 0x798   : > { %2403 = shalt.err (!%p2400_p8)
}
 0x799   : > { %1874 = dma.vmem_to_hbm [thread:$0]  (%p3316_p7), %s1431_s6, 128, %s3154_s21, %s1402_s23   ;;  %v1724_v27 = vld [vmem:[#allocation20] ss:$0 sm:$0xff] }
 0x79a   : > { %v683_v28 = vld [vmem:[%s572_s28] sm:$0xff]  ;;  %s674_s14 = scalar_lea.vmem [#allocation22], %s3010_s15  ;;  %s3317_s0 = sld [smem:[#allocation48_spill]] }
 0x79b   : > { %s1416_s17 = sshll.u32 %s674_s14, 4  ;;  %s1397_s15 = scalar_lea.sflag [#allocation4], %s3007_s24  ;;  %s3186_s17 = int_to_ptr.vmem [resolvable:$true] %s1416_s17 }
 0x79c   : > { %s2404_s28 = scalar_lea.vmem %s3186_s17, 128  ;;  %s2548_s21 = smov [#allocation22]  }
 0x79d   : > { %p2405_p9 = scmp.ne.s32.totalorder %s3186_s17, %s2404_s28  ;;  %s2408_s9 = sshll.u32 %s2548_s21, 4  ;;  %s2409_s9 = int_to_ptr.vmem [resolvable:$false] %s2408_s9 }
 0x79e   : > { %s2410_s6 = scalar_lea.vmem %s2409_s9, 256  ;;  %p2411_p6 = scmp.lt.s32.totalorder %s3186_s17, %s2409_s9 }
 0x79f   : > { %p2406_p1 = pnand %p2405_p9, %p3316_p7  ;;  %p2412_p13 = scmp.lt.s32.totalorder %s2410_s6, %s2404_s28 }
 0x7a0   : > { %s3184_s13 = scalar_lea.hbm %s3317_s0, %s1730_s12 }
 0x7a1   : > { %p2407_p3 = pneg %p2406_p1  ;;  %p2413_p4 = por %p2412_p13, %p2411_p6 }
 0x7a3   : > { %p2414_p5 = pnand %p2413_p4, %p2407_p3 }
 0x85f   : > { %v1379_v29 = vpop.f32.mrb[20].mxu0 }
 0x860   : > { %v1380_v30 = vadd.f32 %v1724_v27, %v1379_v29  ;;  %v1829_v31 = vpop.f32.mrb[21].mxu0 }
 0x861   : > { %v1382_v32 = vpop.f32.mrb[22].mxu0 }
 0x862   : > { %v1385_v33 = vadd.f32 %v1380_v30, %v683_v28  ;;  %v1830_v34 = vpop.f32.mrb[23].mxu0 }
 0x864   : > { %1386 = vst.msk [vmem:[%s674_s14] sm:$0xff] %vm685_vm0, %v1385_v33 }
 0x865   : > { %2417 = shalt.err (!%p2414_p5)
}
 0x866   : > { %s2418_s24 = scalar_lea.hbm %s3184_s13, 128  ;;  %s2422_s8 = scalar_lea.hbm %s3317_s0, 256 }
 0x867   : > { %p2419_p2 = scmp.ne.s32.totalorder %s3184_s13, %s2418_s24  ;;  %p2423_p11 = scmp.lt.u32.totalorder %s3184_s13, %s3317_s0 }
 0x868   : > { %p2424_p10 = scmp.lt.u32.totalorder %s2422_s8, %s2418_s24  ;;  %p2426_p9 = scmp.lt.u32.totalorder %s2418_s24, %s3184_s13 }
 0x869   : > { %p2420_p0 = pnand %p2419_p2, %p3316_p7 }
 0x86a   : > { %p2425_p8 = por %p2424_p10, %p2423_p11 }
 0x86b   : > { %p2421_p12 = pneg %p2420_p0 }
 0x86c   : > { %p2427_p1 = por %p2426_p9, %p2425_p8 }
 0x86e   : > { %p2428_p3 = pnand %p2427_p1, %p2421_p12 }
 0x870   : > { %2431 = shalt.err (!%p2428_p3)
}
 0x871   : > { %1873 = dma.vmem_to_hbm [thread:$0]  (%p3316_p7), %s3186_s17, 128, %s3184_s13, %s1397_s15  }
 0x872 PF: > { %s1442_s20 = sand.u32 1, %s2502_s25   ;;  %p3318_p6 = scmp.ne.s32.totalorder %s3289_s16, 0 }
 0x873   : > { %p3319_p13 = scmp.ge.s32.totalorder %s2522_s30, 2  ;;  %s1443_s14 = scalar_lea.sflag [#allocation4], %s1442_s20 }
 0x875   : > { %p1916_p4 = pnand %p3319_p13, %p3318_p6 }
 0x877   : > { %2493 = dma.done.wait (!%p1916_p4), %s1443_s14, 128  }
 0x878   : > { %2495 = vsyncadd (!%p1916_p4), %s1443_s14, 4294967168  ;;  %s1452_s2 = scalar_lea.sflag [#allocation24], %s1442_s20 }
 0x879   : > { %2497 = dma.done.wait (!%p1916_p4), %s1452_s2, 128  }
 0x87a   : > { %2499 = vsyncadd (!%p1916_p4), %s1452_s2, 4294967168  ;;  %s43_s30 = sadd.s32 1, %s2522_s30   ;;  %s3320_s25 = smov %s2506_s26 }
 0x87b   : > { %p40_p5 = scmp.ge.s32.totalorder %s43_s30, 4   ;;  %s3321_s26 = smov %s2510_s27 }
 0x87c   : > { %s3322_s27 = smov %s2897_s22  ;;  %s3323_s28 = smov %s2518_s29 }
 0x87d   : > { %s3324_s29 = smov %s3326_s4  ;;  %42 = sbr.rel (!%p40_p5) target bundleno = 29 (0x1d), region = 193 }
 0x884   :  { %1457 = vsyncpa [#allocation3], 1 }
 0x885   :  { %1459 = vsyncpa [#allocation3 + $0x1], 1 }
 0x886   :  { %1460 = vsyncpa [#allocation6], 1 }
 0x887   :  { %1462 = vsyncpa [#allocation6 + $0x1], 1 }
 0x888   :  { %1463 = vsyncpa [#allocation9], 1 }
 0x889   :  { %1465 = vsyncpa [#allocation9 + $0x1], 1 }
 0x88a   :  { %1466 = vsyncpa [#allocation12], 1 }
 0x88b   :  { %1467 = vsyncpa [#allocation15], 1 }
 0x88c   :  { %1468 = vsyncpa [#allocation18], 1 }
 0x88d   :  { %1469 = vsyncpa [#allocation21], 1 }
 0x88e   :  { %1470 = vsyncpa [#allocation4], 1 }
 0x88f   :  { %1472 = vsyncpa [#allocation4 + $0x1], 1 }
 0x890   :  { %1473 = vsyncpa [#allocation24], 1 }
 0x891   :  { %1475 = vsyncpa [#allocation24 + $0x1], 1 }

</bundles_post_ra>
